<compile_context>
chip_gen: v7x
topology: tpu7x:2x2x1
jax: 0.10.0
libtpu: 0.0.40
codegen_flags: <defaults>
</compile_context>

<pallas_src>
import functools

import jax
import jax.numpy as jnp
from jax import lax
from jax.experimental import pallas as pl
from jax.experimental.pallas import tpu as pltpu


def _self_attention_kernel(x_ref, w_ref, b_ref, gamma_ref, out_ref, *, bt, cq):
    gamma = gamma_ref[0]                                       # scalar from SMEM
    w = w_ref[...]                                             # (2*Cq+C, C)
    bias = b_ref[...]                                          # (2*Cq+C, 1)

    for b in range(bt):                                        # Bt small & static
        x = x_ref[b]                                           # (C, N)

        # Fused q/k/v 1x1 convolutions: one (2*Cq+C, C) @ (C, N) MXU matmul,
        # one bias broadcast-add, then static sublane-aligned slices.
        qkv = jnp.dot(w, x, preferred_element_type=jnp.float32) + bias   # (2Cq+C, N)
        q = qkv[0:cq]                                          # (Cq, N)
        k = qkv[cq:2 * cq]                                     # (Cq, N)
        v = qkv[2 * cq:]                                       # (C,  N)

        # Attention logits, already transposed: e_t[j, i] = <k[:, j], q[:, i]>.
        # bf16 operands, f32 accumulation on the MXU.
        e_t = lax.dot_general(k.astype(jnp.bfloat16), q.astype(jnp.bfloat16),
                              (((0,), (0,)), ((), ())),
                              preferred_element_type=jnp.float32)        # (Nk, Nq)

        # Numerically-stable softmax over keys (axis 0 = sublane axis);
        # normalization deferred.
        m = jnp.max(e_t, axis=0, keepdims=True)                          # (1, Nq)
        p = jnp.exp(e_t - m)                                             # (Nk, Nq)
        l = jnp.sum(p, axis=0, keepdims=True)                            # (1, Nq)

        # o_un[:, i] = sum_j v[:, j] * p[j, i]: plain (C, Nk) @ (Nk, Nq).
        o_un = jnp.dot(v.astype(jnp.bfloat16), p.astype(jnp.bfloat16),
                       preferred_element_type=jnp.float32)               # (C, Nq)

        # gamma * softmax-normalized attention output + residual.
        # (activation is None by default in the module, so it is skipped.)
        scale = gamma * pl.reciprocal(l, approx=True)                    # (1, Nq)
        out_ref[b] = (o_un * scale + x).astype(out_ref.dtype)


def _vmem_cap_bytes():
    try:
        return int(pltpu.get_tpu_info().vmem_capacity_bytes)
    except Exception:
        return 64 * 1024 * 1024           # conservative (v7x-sized) fallback


def _pick_bt(batch, per_item_bytes, budget_bytes):
    """Largest divisor of `batch` that is <= 8 and keeps I/O blocks in budget."""
    best = 1
    for cand in range(2, min(batch, 8) + 1):
        if batch % cand == 0 and cand * per_item_bytes <= budget_bytes:
            best = cand
    return best


@jax.jit
def self_attention(x, wq, bq, wk, bk, wv, bv, gamma):
    """x: (B, C, H, W) float32 NCHW.  Returns (B, C, H, W)."""
    B, C, H, W = x.shape
    N = H * W
    Cq = wq.shape[0]
    O = 2 * Cq + C

    x_cn = x.reshape(B, C, N)             # pure reshape -- no HBM transpose

    # Fused projection weights / biases (tiny concat, fused by XLA).
    w_all = jnp.concatenate([wq, wk, wv], axis=0)                     # (O, C)
    b_all = jnp.concatenate([bq, bk, bv], axis=0).reshape(O, 1)       # (O, 1)

    # Per-generation VMEM cap: full capacity minus headroom (~100 MiB on
    # v5e/v6e, ~36 MiB on v7x) instead of a hard 64 MiB clamp.
    gen_cap = max(32 * 1024 * 1024, _vmem_cap_bytes() - 28 * 1024 * 1024)

    # Images per grid step (amortizes per-step overhead / DMA latency).
    Bt = _pick_bt(B, 16 * C * N, gen_cap // 4)

    # Working-set estimate (bytes): double-buffered I/O blocks + attention
    # temporaries (f32 logits, f32 + bf16 probabilities) + projections.
    vmem_est = (4 * Bt * C * N * 4            # x + out blocks, double-buffered
                + N * N * (4 + 4 + 2)         # e_t (f32) + p (f32) + p (bf16)
                + 4 * O * (C + N)             # fused weights + qkv
                + 8 * C * N                   # v operand copy + o_un
                + (2 << 20))
    vmem_limit = int(min(gen_cap, max(32 * 1024 * 1024, 2 * vmem_est)))

    kernel = functools.partial(_self_attention_kernel, bt=Bt, cq=Cq)

    out_cn = pl.pallas_call(
        kernel,
        out_shape=jax.ShapeDtypeStruct((B, C, N), x.dtype),
        grid_spec=pltpu.PrefetchScalarGridSpec(
            num_scalar_prefetch=0,
            grid=(B // Bt,),
            in_specs=[
                pl.BlockSpec((Bt, C, N), lambda g: (g, 0, 0)),        # x (Bt images)
                pl.BlockSpec((O, C), lambda g: (0, 0)),               # fused Wqkv
                pl.BlockSpec((O, 1), lambda g: (0, 0)),               # fused bias
                pl.BlockSpec(memory_space=pltpu.MemorySpace.SMEM),    # gamma (scalar)
            ],
            out_specs=pl.BlockSpec((Bt, C, N), lambda g: (g, 0, 0)),
        ),
        compiler_params=pltpu.CompilerParams(
            dimension_semantics=("parallel",),    # batch groups feed both TCs
            vmem_limit_bytes=vmem_limit,
        ),
    )(x_cn, w_all, b_all, gamma.reshape(1))

    return out_cn.reshape(B, C, H, W)


def ref_forward(x, wq, bq, wk, bk, wv, bv, gamma):
    """Pure-JAX f32 reference mirroring the PyTorch forward exactly."""
    B, C, H, W = x.shape
    N = H * W
    xf = x.reshape(B, C, N)
    q = jnp.einsum('oc,bcn->bon', wq, xf) + bq[None, :, None]         # (B, Cq, N)
    k = jnp.einsum('oc,bcn->bon', wk, xf) + bk[None, :, None]         # (B, Cq, N)
    v = jnp.einsum('oc,bcn->bon', wv, xf) + bv[None, :, None]         # (B, C, N)
    energy = jnp.einsum('bci,bcj->bij', q, k)                         # (B, N, N)
    attn = jax.nn.softmax(energy, axis=-1)
    out = jnp.einsum('bcj,bij->bci', v, attn)                         # (B, C, N)
    out = out.reshape(B, C, H, W)
    return gamma[0] * out + x


if __name__ == "__main__":
    key = jax.random.PRNGKey(0)
    B, C, H, W = 2, 64, 16, 16
    squeeze = 8
    Cq = C // squeeze

    ks = jax.random.split(key, 7)
    x = jax.random.normal(ks[0], (B, C, H, W), jnp.float32)
    # Conv2d(kernel_size=1) weights are (out, in, 1, 1); stored as (out, in).
    wq = 0.1 * jax.random.normal(ks[1], (Cq, C), jnp.float32)
    bq = 0.1 * jax.random.normal(ks[2], (Cq,), jnp.float32)
    wk = 0.1 * jax.random.normal(ks[3], (Cq, C), jnp.float32)
    bk = 0.1 * jax.random.normal(ks[4], (Cq,), jnp.float32)
    wv = 0.1 * jax.random.normal(ks[5], (C, C), jnp.float32)
    bv = 0.1 * jax.random.normal(ks[6], (C,), jnp.float32)

    gamma0 = jnp.zeros((1,), jnp.float32)       # module init: gamma = 0
    gamma1 = jnp.array([0.7], jnp.float32)      # nonzero gamma exercises attention

    out0 = jax.block_until_ready(self_attention(x, wq, bq, wk, bk, wv, bv, gamma0))
    out1 = jax.block_until_ready(self_attention(x, wq, bq, wk, bk, wv, bv, gamma1))

    ref0 = ref_forward(x, wq, bq, wk, bk, wv, bv, gamma0)
    ref1 = ref_forward(x, wq, bq, wk, bk, wv, bv, gamma1)

    # Tolerance sized for the bf16 MXU operands of the two N x N matmuls plus
    # the approximate EUP reciprocal in the deferred softmax normalization;
    # any structural/indexing error would be 10-100x larger.
    assert jnp.allclose(out0, ref0, atol=2e-2, rtol=2e-2), "gamma=0 mismatch"
    assert jnp.allclose(out1, ref1, atol=2e-2, rtol=2e-2), "gamma!=0 mismatch"

    print("KERNEL_OK")
</pallas_src>

<mosaic_0001>
module attributes {stable_mosaic.version = 11 : i64} {
  func.func @_self_attention_kernel(%arg0: i32, %arg1: memref<2x64x256xf32, #tpu.memory_space<vmem>>, %arg2: memref<80x64xf32, #tpu.memory_space<vmem>>, %arg3: memref<80x1xf32, #tpu.memory_space<vmem>>, %arg4: memref<1xf32, #tpu.memory_space<smem>>, %arg5: memref<2x64x256xf32, #tpu.memory_space<vmem>>) attributes {dimension_semantics = [#tpu.dimension_semantics<parallel>], iteration_bounds = array<i64: 1>, scalar_prefetch = 0 : i64, scratch_operands = 0 : i64, tpu.core_type = #tpu.core_type<tc>, window_params = [{transform_indices = @transform_0, window_bounds = array<i64: 2, 64, 256>}, {pipeline_mode = #tpu.pipeline_mode<synchronous>, transform_indices = @transform_1, window_bounds = array<i64: 80, 64>}, {pipeline_mode = #tpu.pipeline_mode<synchronous>, transform_indices = @transform_2, window_bounds = array<i64: 80, 1>}, {transform_indices = @transform_3, window_bounds = array<i64: 1>}, {transform_indices = @transform_4, window_bounds = array<i64: 2, 64, 256>}]} {
    %c0 = arith.constant 0 : index
    %0 = memref.load %arg4[%c0] : memref<1xf32, #tpu.memory_space<smem>>
    %c0_0 = arith.constant 0 : index
    %c0_1 = arith.constant 0 : index
    %1 = vector.load %arg2[%c0_0, %c0_1] : memref<80x64xf32, #tpu.memory_space<vmem>>, vector<80x64xf32>
    %c0_2 = arith.constant 0 : index
    %c0_3 = arith.constant 0 : index
    %2 = vector.load %arg3[%c0_2, %c0_3] : memref<80x1xf32, #tpu.memory_space<vmem>>, vector<80x1xf32>
    %c0_4 = arith.constant 0 : index
    %c0_5 = arith.constant 0 : index
    %c0_6 = arith.constant 0 : index
    %3 = vector.load %arg1[%c0_4, %c0_5, %c0_6] : memref<2x64x256xf32, #tpu.memory_space<vmem>>, vector<1x64x256xf32>
    %4 = vector.shape_cast %3 : vector<1x64x256xf32> to vector<64x256xf32>
    %cst = arith.constant dense<0.000000e+00> : vector<80x256xf32>
    %5 = tpu.matmul %1, %4, %cst {dimension_numbers = #tpu.dot_dimension_numbers<[1], [0], [0], [1], [0, 0, 1, 1], [], []>} : vector<80x64xf32>, vector<64x256xf32>, vector<80x256xf32> -> vector<80x256xf32>
    %6 = vector.broadcast %2 : vector<80x1xf32> to vector<80x256xf32>
    %7 = arith.addf %5, %6 : vector<80x256xf32>
    %8 = vector.extract_strided_slice %7 {offsets = [0, 0], sizes = [8, 256], strides = [1, 1]} : vector<80x256xf32> to vector<8x256xf32>
    %9 = vector.extract_strided_slice %7 {offsets = [8, 0], sizes = [8, 256], strides = [1, 1]} : vector<80x256xf32> to vector<8x256xf32>
    %10 = vector.extract_strided_slice %7 {offsets = [16, 0], sizes = [64, 256], strides = [1, 1]} : vector<80x256xf32> to vector<64x256xf32>
    %11 = arith.truncf %9 : vector<8x256xf32> to vector<8x256xbf16>
    %12 = arith.truncf %8 : vector<8x256xf32> to vector<8x256xbf16>
    %cst_7 = arith.constant dense<0.000000e+00> : vector<256x256xf32>
    %13 = tpu.matmul %11, %12, %cst_7 {dimension_numbers = #tpu.dot_dimension_numbers<[0], [0], [1], [1], [0, 1, 1, 1], [], []>} : vector<8x256xbf16>, vector<8x256xbf16>, vector<256x256xf32> -> vector<256x256xf32>
    %cst_8 = arith.constant dense<0xFF800000> : vector<256xf32>
    %14 = vector.multi_reduction <maximumf>, %13, %cst_8 [0] : vector<256x256xf32> to vector<256xf32>
    %15 = vector.shape_cast %14 : vector<256xf32> to vector<1x256xf32>
    %16 = vector.broadcast %15 : vector<1x256xf32> to vector<256x256xf32>
    %17 = arith.subf %13, %16 : vector<256x256xf32>
    %18 = math.exp %17 : vector<256x256xf32>
    %cst_9 = arith.constant dense<0.000000e+00> : vector<256xf32>
    %19 = vector.multi_reduction <add>, %18, %cst_9 [0] : vector<256x256xf32> to vector<256xf32>
    %20 = vector.shape_cast %19 : vector<256xf32> to vector<1x256xf32>
    %21 = arith.truncf %10 : vector<64x256xf32> to vector<64x256xbf16>
    %22 = arith.truncf %18 : vector<256x256xf32> to vector<256x256xbf16>
    %cst_10 = arith.constant dense<0.000000e+00> : vector<64x256xf32>
    %23 = tpu.matmul %21, %22, %cst_10 {dimension_numbers = #tpu.dot_dimension_numbers<[1], [0], [0], [1], [0, 0, 1, 1], [], []>} : vector<64x256xbf16>, vector<256x256xbf16>, vector<64x256xf32> -> vector<64x256xf32>
    %24 = tpu.reciprocal %20 {approx = true} : vector<1x256xf32> -> vector<1x256xf32>
    %25 = vector.broadcast %0 : f32 to vector<1x256xf32>
    %26 = arith.mulf %25, %24 : vector<1x256xf32>
    %27 = vector.broadcast %26 : vector<1x256xf32> to vector<64x256xf32>
    %28 = arith.mulf %23, %27 : vector<64x256xf32>
    %29 = arith.addf %28, %4 : vector<64x256xf32>
    %c0_11 = arith.constant 0 : index
    %c0_12 = arith.constant 0 : index
    %c0_13 = arith.constant 0 : index
    %30 = vector.load %arg5[%c0_11, %c0_12, %c0_13] : memref<2x64x256xf32, #tpu.memory_space<vmem>>, vector<1x64x256xf32>
    %31 = vector.shape_cast %30 : vector<1x64x256xf32> to vector<64x256xf32>
    %32 = vector.shape_cast %29 : vector<64x256xf32> to vector<1x64x256xf32>
    tpu.vector_store %arg5[%c0_11, %c0_12, %c0_13], %32 {strides = array<i32>} : memref<2x64x256xf32, #tpu.memory_space<vmem>>, vector<1x64x256xf32>,
    %c1 = arith.constant 1 : index
    %c0_14 = arith.constant 0 : index
    %c0_15 = arith.constant 0 : index
    %33 = vector.load %arg1[%c1, %c0_14, %c0_15] : memref<2x64x256xf32, #tpu.memory_space<vmem>>, vector<1x64x256xf32>
    %34 = vector.shape_cast %33 : vector<1x64x256xf32> to vector<64x256xf32>
    %cst_16 = arith.constant dense<0.000000e+00> : vector<80x256xf32>
    %35 = tpu.matmul %1, %34, %cst_16 {dimension_numbers = #tpu.dot_dimension_numbers<[1], [0], [0], [1], [0, 0, 1, 1], [], []>} : vector<80x64xf32>, vector<64x256xf32>, vector<80x256xf32> -> vector<80x256xf32>
    %36 = vector.broadcast %2 : vector<80x1xf32> to vector<80x256xf32>
    %37 = arith.addf %35, %36 : vector<80x256xf32>
    %38 = vector.extract_strided_slice %37 {offsets = [0, 0], sizes = [8, 256], strides = [1, 1]} : vector<80x256xf32> to vector<8x256xf32>
    %39 = vector.extract_strided_slice %37 {offsets = [8, 0], sizes = [8, 256], strides = [1, 1]} : vector<80x256xf32> to vector<8x256xf32>
    %40 = vector.extract_strided_slice %37 {offsets = [16, 0], sizes = [64, 256], strides = [1, 1]} : vector<80x256xf32> to vector<64x256xf32>
    %41 = arith.truncf %39 : vector<8x256xf32> to vector<8x256xbf16>
    %42 = arith.truncf %38 : vector<8x256xf32> to vector<8x256xbf16>
    %cst_17 = arith.constant dense<0.000000e+00> : vector<256x256xf32>
    %43 = tpu.matmul %41, %42, %cst_17 {dimension_numbers = #tpu.dot_dimension_numbers<[0], [0], [1], [1], [0, 1, 1, 1], [], []>} : vector<8x256xbf16>, vector<8x256xbf16>, vector<256x256xf32> -> vector<256x256xf32>
    %cst_18 = arith.constant dense<0xFF800000> : vector<256xf32>
    %44 = vector.multi_reduction <maximumf>, %43, %cst_18 [0] : vector<256x256xf32> to vector<256xf32>
    %45 = vector.shape_cast %44 : vector<256xf32> to vector<1x256xf32>
    %46 = vector.broadcast %45 : vector<1x256xf32> to vector<256x256xf32>
    %47 = arith.subf %43, %46 : vector<256x256xf32>
    %48 = math.exp %47 : vector<256x256xf32>
    %cst_19 = arith.constant dense<0.000000e+00> : vector<256xf32>
    %49 = vector.multi_reduction <add>, %48, %cst_19 [0] : vector<256x256xf32> to vector<256xf32>
    %50 = vector.shape_cast %49 : vector<256xf32> to vector<1x256xf32>
    %51 = arith.truncf %40 : vector<64x256xf32> to vector<64x256xbf16>
    %52 = arith.truncf %48 : vector<256x256xf32> to vector<256x256xbf16>
    %cst_20 = arith.constant dense<0.000000e+00> : vector<64x256xf32>
    %53 = tpu.matmul %51, %52, %cst_20 {dimension_numbers = #tpu.dot_dimension_numbers<[1], [0], [0], [1], [0, 0, 1, 1], [], []>} : vector<64x256xbf16>, vector<256x256xbf16>, vector<64x256xf32> -> vector<64x256xf32>
    %54 = tpu.reciprocal %50 {approx = true} : vector<1x256xf32> -> vector<1x256xf32>
    %55 = vector.broadcast %0 : f32 to vector<1x256xf32>
    %56 = arith.mulf %55, %54 : vector<1x256xf32>
    %57 = vector.broadcast %56 : vector<1x256xf32> to vector<64x256xf32>
    %58 = arith.mulf %53, %57 : vector<64x256xf32>
    %59 = arith.addf %58, %34 : vector<64x256xf32>
    %c1_21 = arith.constant 1 : index
    %c0_22 = arith.constant 0 : index
    %c0_23 = arith.constant 0 : index
    %60 = vector.load %arg5[%c1_21, %c0_22, %c0_23] : memref<2x64x256xf32, #tpu.memory_space<vmem>>, vector<1x64x256xf32>
    %61 = vector.shape_cast %60 : vector<1x64x256xf32> to vector<64x256xf32>
    %62 = vector.shape_cast %59 : vector<64x256xf32> to vector<1x64x256xf32>
    tpu.vector_store %arg5[%c1_21, %c0_22, %c0_23], %62 {strides = array<i32>} : memref<2x64x256xf32, #tpu.memory_space<vmem>>, vector<1x64x256xf32>,
    return
  }
  func.func @transform_0(%arg0: i32) -> (i32, i32, i32) {
    %c0_i32 = arith.constant 0 : i32
    %c0_i32_0 = arith.constant 0 : i32
    %c0_i32_1 = arith.constant 0 : i32
    return %arg0, %c0_i32, %c0_i32_0 : i32, i32, i32
  }
  func.func @transform_1(%arg0: i32) -> (i32, i32) {
    %c0_i32 = arith.constant 0 : i32
    %c0_i32_0 = arith.constant 0 : i32
    %c0_i32_1 = arith.constant 0 : i32
    return %c0_i32, %c0_i32_0 : i32, i32
  }
  func.func @transform_2(%arg0: i32) -> (i32, i32) {
    %c0_i32 = arith.constant 0 : i32
    %c0_i32_0 = arith.constant 0 : i32
    %c0_i32_1 = arith.constant 0 : i32
    return %c0_i32, %c0_i32_0 : i32, i32
  }
  func.func @transform_3(%arg0: i32) -> i32 {
    %c0_i32 = arith.constant 0 : i32
    %c0_i32_0 = arith.constant 0 : i32
    return %c0_i32 : i32
  }
  func.func @transform_4(%arg0: i32) -> (i32, i32, i32) {
    %c0_i32 = arith.constant 0 : i32
    %c0_i32_0 = arith.constant 0 : i32
    %c0_i32_1 = arith.constant 0 : i32
    return %arg0, %c0_i32, %c0_i32_0 : i32, i32, i32
  }
}

</mosaic_0001>

<bundles_post_ra>
// kernel: self_attention.1
= control target key start
LH: loop header
LB: loop body
LE: loop exit
PB: predicated region body
PF: predicated region fallthrough
CT: control target
= control target key end

     0   :  { %v4439_v3 = vmov 0.0   ;;  %v4437_v4 = vmov 0   ;;  %vm106_vm0 = vcmask 523264   ;;  %vm347_vm1 = vcmask 1043456   ;;  %s4432_s0 = inlined_call_operand.vmem [shape: f32[2,64,256], index: 0, kind: input, shape index: {}]   ;;  %s4433_s2 = inlined_call_operand.vmem [shape: f32[80,1], index: 2, kind: input, shape index: {}]   ;;  %s4434_s1 = inlined_call_operand.vmem [shape: f32[80,64], index: 1, kind: input, shape index: {}]   ;;  %s4435_s3 = inlined_call_operand.<no memory space> [shape: f32[1], index: 3, kind: input, shape index: {}]   ;;  %s4436_s4 = inlined_call_operand.vmem [shape: f32[2,64,256], index: 4, kind: output, shape index: {}]  }
   0x1   :  { %v41_v0 = vld [vmem:[%s4432_s0 + $0x8] sm:$0xff]  ;;  %v43_v1 = vld [vmem:[%s4432_s0 + $0x18] sm:$0xff]  ;;  %v40_v2 = vld [vmem:[%s4432_s0] sm:$0xff]  ;;  %201 = vmatprep.mubr.f32.mxu0 %v4439_v3  ;;  %2108 = vset.pattern.permute.xlu0 %v4437_v4  ;;  %vm298_vm2 = vcmask 64512  }
   0x2   :  { %v2074_v5 = vpack.c.bf16 %v43_v1, %v41_v0  ;;  %v42_v6 = vld [vmem:[%s4432_s0 + $0x10] sm:$0xff]  ;;  %v45_v7 = vld [vmem:[%s4432_s0 + $0x28] sm:$0xff]  ;;  %v47_v8 = vld [vmem:[%s4432_s0 + $0x38] sm:$0xff]  ;;  %386 = vmatprep.mubr.bf16.mxu1 %v4437_v4 }
   0x3   :  { %v2076_v9 = vpack.c.bf16 %v42_v6, %v40_v2  ;;  %v2078_v10 = vpack.c.bf16 %v47_v8, %v45_v7  ;;  %v44_v11 = vld [vmem:[%s4432_s0 + $0x20] sm:$0xff]  ;;  %v46_v12 = vld [vmem:[%s4432_s0 + $0x30] sm:$0xff]  ;;  %v49_v13 = vld [vmem:[%s4432_s0 + $0x48] sm:$0xff] }
   0x4   :  { %2075 = vmatprep.subr.bf16.mxu0 %v2074_v5  ;;  %v51_v14 = vld [vmem:[%s4432_s0 + $0x58] sm:$0xff]  ;;  %v2080_v15 = vpack.c.bf16 %v46_v12, %v44_v11  ;;  %v48_v17 = vld [vmem:[%s4432_s0 + $0x40] sm:$0xff]  ;;  %v50_v18 = vld [vmem:[%s4432_s0 + $0x50] sm:$0xff] }
   0x5   :  { %2077 = vmatpush1.bf16.msra.mxu0 %v2076_v9  ;;  %v2082_v16 = vpack.c.bf16 %v51_v14, %v49_v13  ;;  %v53_v19 = vld [vmem:[%s4432_s0 + $0x68] sm:$0xff]  ;;  %v55_v20 = vld [vmem:[%s4432_s0 + $0x78] sm:$0xff]  ;;  %v2084_v21 = vpack.c.bf16 %v50_v18, %v48_v17  ;;  %v52_v24 = vld [vmem:[%s4432_s0 + $0x60] sm:$0xff] }
   0x6   :  { %2079 = vmatprep.subr.bf16.mxu0 %v2078_v10  ;;  %v31_v22 = vld [vmem:[%s4433_s2 + $0x8] sm:$0xff]  ;;  %v2086_v23 = vpack.c.bf16 %v55_v20, %v53_v19  ;;  %v54_v25 = vld [vmem:[%s4432_s0 + $0x70] sm:$0xff]  ;;  %v30_v26 = vld [vmem:[%s4433_s2] sm:$0xff] }
   0x7   :  { %63 = vperm.xlu0 %2108, %v31_v22   ;;  %v2088_v27 = vpack.c.bf16 %v54_v25, %v52_v24  ;;  %v32_v28 = vld [vmem:[%s4433_s2 + $0x10] sm:$0xff]  ;;  %v20_v29 = vld [vmem:[%s4434_s1] sm:$0xff]  ;;  %v33_v30 = vld [vmem:[%s4433_s2 + $0x18] sm:$0xff] }
   0x8   :  { %v21_v31 = vld [vmem:[%s4434_s1 + $0x8] sm:$0xff]  ;;  %v34_v32 = vld [vmem:[%s4433_s2 + $0x20] sm:$0xff]  ;;  %v22_v33 = vld [vmem:[%s4434_s1 + $0x10] sm:$0xff] }
   0x9   :  { %2081 = vmatpush1.bf16.msra.mxu0 %v2080_v15  ;;  %v35_v34 = vld [vmem:[%s4433_s2 + $0x28] sm:$0xff]  ;;  %v23_v35 = vld [vmem:[%s4434_s1 + $0x18] sm:$0xff]  ;;  %v36_v36 = vld [vmem:[%s4433_s2 + $0x30] sm:$0xff] }
   0xa   :  { %2083 = vmatprep.subr.bf16.mxu0 %v2082_v16  ;;  %v24_v37 = vld [vmem:[%s4434_s1 + $0x20] sm:$0xff]  ;;  %v37_v38 = vld [vmem:[%s4433_s2 + $0x38] sm:$0xff]  ;;  %v25_v39 = vld [vmem:[%s4434_s1 + $0x28] sm:$0xff] }
   0xb   :  { %58 = vperm.xlu0 %2108, %v30_v26   ;;  %v38_v40 = vld [vmem:[%s4433_s2 + $0x40] sm:$0xff]  ;;  %v26_v41 = vld [vmem:[%s4434_s1 + $0x30] sm:$0xff]  ;;  %v27_v42 = vld [vmem:[%s4434_s1 + $0x38] sm:$0xff] }
   0xc   :  { %v28_v43 = vld [vmem:[%s4434_s1 + $0x40] sm:$0xff]  ;;  %v29_v44 = vld [vmem:[%s4434_s1 + $0x48] sm:$0xff] }
   0xd   :  { %2085 = vmatpush1.bf16.msra.mxu0 %v2084_v21 }
   0xe   :  { %2087 = vmatprep.subr.bf16.mxu0 %v2086_v23 }
   0xf   :  { %68 = vperm.xlu0 %2108, %v32_v28  }
  0x11   :  { %2089 = vmatpush1.bf16.msra.mxu0 %v2088_v27 }
  0x13   :  { %73 = vperm.xlu0 %2108, %v33_v30  }
  0x14   :  { %1988 = vmatmul.mubr.msk.f32.vlgmr.msra.gmra.mrb[0].mxu0 %vm106_vm0, %v20_v29 }
  0x15   :  { %207 = vmatprep.mubr.f32.mxu0 %v4439_v3 }
  0x17   :  { %78 = vperm.xlu0 %2108, %v34_v32  }
  0x18   :  { %1989 = vmatmul.mubr.msk.f32.gmra.mrb[2].mxu0 %vm106_vm0, %v21_v31 }
  0x19   :  { %213 = vmatprep.mubr.f32.mxu0 %v4439_v3 }
  0x1b   :  { %83 = vperm.xlu0 %2108, %v35_v34  }
  0x1c   :  { %1990 = vmatmul.mubr.msk.f32.gmra.mrb[4].mxu0 %vm106_vm0, %v22_v33 }
  0x1d   :  { %219 = vmatprep.mubr.f32.mxu0 %v4439_v3 }
  0x1f   :  { %88 = vperm.xlu0 %2108, %v36_v36  }
  0x20   :  { %1991 = vmatmul.mubr.msk.f32.gmra.mrb[6].mxu0 %vm106_vm0, %v23_v35 }
  0x21   :  { %225 = vmatprep.mubr.f32.mxu0 %v4439_v3 }
  0x23   :  { %93 = vperm.xlu0 %2108, %v37_v38   ;;  %v39_v38 = vld [vmem:[%s4433_s2 + $0x48] sm:$0xff] }
  0x24   :  { %1992 = vmatmul.mubr.msk.f32.gmra.mrb[8].mxu0 %vm106_vm0, %v24_v37 }
  0x25   :  { %231 = vmatprep.mubr.f32.mxu0 %v4439_v3 }
  0x27   :  { %98 = vperm.xlu0 %2108, %v38_v40  }
  0x28   :  { %1993 = vmatmul.mubr.msk.f32.gmra.mrb[10].mxu0 %vm106_vm0, %v25_v39 }
  0x29   :  { %237 = vmatprep.mubr.f32.mxu0 %v4439_v3 }
  0x2c   :  { %1994 = vmatmul.mubr.msk.f32.gmra.mrb[12].mxu0 %vm106_vm0, %v26_v41 }
  0x2d   :  { %243 = vmatprep.mubr.f32.mxu0 %v4439_v3 }
  0x30   :  { %1995 = vmatmul.mubr.msk.f32.gmra.mrb[14].mxu0 %vm106_vm0, %v27_v42 }
  0x31   :  { %249 = vmatprep.mubr.f32.mxu0 %v4439_v3 }
  0x34   :  { %1996 = vmatmul.mubr.msk.f32.gmra.mrb[16].mxu0 %vm106_vm0, %v28_v43 }
  0x35   :  { %255 = vmatprep.mubr.f32.mxu0 %v4439_v3 }
  0x38   :  { %1997 = vmatmul.mubr.msk.f32.gmra.mrb[18].mxu0 %vm106_vm0, %v29_v44 }
  0x86   :  { %v2570_v45 = vpop.permute.xlu0 %63 }
  0x87   :  { %4575 = vst [vmem:[#allocation3_spill] sm:$0xff] %v2570_v45 }
  0x8a   :  { %v2572_v46 = vpop.permute.xlu0 %58 }
  0x8b   :  { %4576 = vst [vmem:[#allocation4_spill] sm:$0xff] %v2572_v46 }
  0x8e   :  { %v2574_v47 = vpop.permute.xlu0 %68 }
  0x8f   :  { %4577 = vst [vmem:[#allocation5_spill] sm:$0xff] %v2574_v47 }
  0x92   :  { %v2578_v53 = vpop.permute.xlu0 %73 }
  0x93   :  { %4578 = vst [vmem:[#allocation6_spill] sm:$0xff] %v2578_v53 }
  0x96   :  { %v2583_v62 = vpop.permute.xlu0 %78 }
  0x97   :  { %4579 = vst [vmem:[#allocation7_spill] sm:$0xff] %v2583_v62 }
  0x9a   :  { %v2595_v8 = vpop.permute.xlu0 %83 }
  0x9b   :  { %4582 = vst [vmem:[#allocation10_spill] sm:$0xff] %v2595_v8 }
  0x9e   :  { %v2603_v16 = vpop.permute.xlu0 %88 }
  0x9f   :  { %4585 = vst [vmem:[#allocation13_spill] sm:$0xff] %v2603_v16 }
  0xa2   :  { %v2615_v23 = vpop.permute.xlu0 %93 }
  0xa3   :  { %4588 = vst [vmem:[#allocation16_spill] sm:$0xff] %v2615_v23 }
  0xe7   :  { %v203_v48 = vpop.f32.mrb[0].mxu0 }
  0xe8   :  { %v204_v49 = vadd.f32 %v203_v48, %v2572_v46  ;;  %v205_v50 = vpop.f32.mrb[1].mxu0 }
  0xe9   :  { %v206_v51 = vadd.f32 %v205_v50, %v2572_v46 }
  0xea   :  { %v264_v52 = vpack.c.bf16 %v204_v49, %v204_v49 }
  0xeb   :  { %v265_v54 = vpack.c.bf16 %v206_v51, %v206_v51  ;;  %v209_v55 = vpop.f32.mrb[2].mxu0 }
  0xec   :  { %v211_v56 = vpop.f32.mrb[3].mxu0  ;;  %v349_v57 = vsel %vm347_vm1, %v264_v52, 0  ;;  %v210_v58 = vadd.f32 %v209_v55, %v2570_v45 }
  0xed   :  { %1998 = vmatprep.subr.msk.bf16.mxu1 %vm347_vm1, %v265_v54  ;;  %v212_v31 = vadd.f32 %v211_v56, %v2570_v45 }
  0xee   :  { %355 = vmatpush1.bf16.msra.mxu1 %v349_v57  ;;  %v262_v59 = vpack.c.bf16 %v210_v58, %v210_v58 }
  0xef   :  { %v215_v60 = vpop.f32.mrb[4].mxu0  ;;  %v263_v35 = vpack.c.bf16 %v212_v31, %v212_v31 }
  0xf0   :  { %v217_v61 = vpop.f32.mrb[5].mxu0  ;;  %266 = vxpose.xlu1.c.b16.start.end [1/1] (short) %v262_v59, 128  ;;  %v2586_v0 = vadd.f32 %v215_v60, %v2574_v47  ;;  %v2660_v59 = vpop.permute.xlu0 %98 }
  0xf1   :  { %v218_v5 = vadd.f32 %v217_v61, %v2574_v47  ;;  %4593 = vst [vmem:[#allocation21_spill] sm:$0xff] %v2660_v59 }
  0xf2   :  { %4580 = vst [vmem:[#allocation8_spill] sm:$0xff] %v2586_v0 }
  0xf3   :  { %v221_v63 = vpop.f32.mrb[6].mxu0 }
  0xf4   :  { %v2589_v1 = vadd.f32 %v221_v63, %v2578_v53  ;;  %v223_v2 = vpop.f32.mrb[7].mxu0 }
  0xf5   :  { %v224_v6 = vadd.f32 %v223_v2, %v2578_v53 }
  0xf6   :  { %4581 = vst [vmem:[#allocation9_spill] sm:$0xff] %v2589_v1 }
  0xf7   :  { %v888_v9 = vpack.c.bf16 %v224_v6, %v218_v5  ;;  %v227_v10 = vpop.f32.mrb[8].mxu0 }
  0xf8   :  { %v229_v11 = vpop.f32.mrb[9].mxu0  ;;  %v2598_v13 = vadd.f32 %v227_v10, %v2583_v62 }
  0xf9   :  { %959 = vmatprep.mubr.bf16.mxu0 %v888_v9  ;;  %v2606_v17 = vadd.f32 %v229_v11, %v2583_v62 }
  0xfa   :  { %4583 = vst [vmem:[#allocation11_spill] sm:$0xff] %v2598_v13 }
  0xfb   :  { %v233_v12 = vpop.f32.mrb[10].mxu0  ;;  %4586 = vst [vmem:[#allocation14_spill] sm:$0xff] %v2606_v17 }
  0xfc   :  { %v2601_v14 = vadd.f32 %v233_v12, %v2595_v8  ;;  %v235_v15 = vpop.f32.mrb[11].mxu0 }
  0xfd   :  { %v2609_v18 = vadd.f32 %v235_v15, %v2595_v8 }
  0xfe   :  { %4584 = vst [vmem:[#allocation12_spill] sm:$0xff] %v2601_v14 }
  0xff   :  { %4587 = vst [vmem:[#allocation15_spill] sm:$0xff] %v2609_v18  ;;  %v239_v21 = vpop.f32.mrb[12].mxu0 }
 0x100   :  { %v241_v22 = vpop.f32.mrb[13].mxu0  ;;  %v2618_v25 = vadd.f32 %v239_v21, %v2603_v16 }
 0x101   :  { %v2624_v28 = vadd.f32 %v241_v22, %v2603_v16 }
 0x102   :  { %4589 = vst [vmem:[#allocation17_spill] sm:$0xff] %v2618_v25 }
 0x103   :  { %v245_v24 = vpop.f32.mrb[14].mxu0  ;;  %4591 = vst [vmem:[#allocation19_spill] sm:$0xff] %v2624_v28 }
 0x104   :  { %v2621_v26 = vadd.f32 %v245_v24, %v2615_v23  ;;  %v247_v27 = vpop.f32.mrb[15].mxu0 }
 0x105   :  { %v2627_v29 = vadd.f32 %v247_v27, %v2615_v23 }
 0x106   :  { %4590 = vst [vmem:[#allocation18_spill] sm:$0xff] %v2621_v26 }
 0x107   :  { %4592 = vst [vmem:[#allocation20_spill] sm:$0xff] %v2627_v29  ;;  %v251_v33 = vpop.f32.mrb[16].mxu0 }
 0x108   :  { %v253_v34 = vpop.f32.mrb[17].mxu0  ;;  %v2665_v61 = vadd.f32 %v251_v33, %v2660_v59 }
 0x109   :  { %v2668_v63 = vadd.f32 %v253_v34, %v2660_v59 }
 0x10a   :  { %4595 = vst [vmem:[#allocation23_spill] sm:$0xff] %v2665_v61 }
 0x10b   :  { %v257_v36 = vpop.f32.mrb[18].mxu0  ;;  %4596 = vst [vmem:[#allocation24_spill] sm:$0xff] %v2668_v63 }
 0x10c   :  { %v259_v37 = vpop.f32.mrb[19].mxu0 }
 0x10d   :  { %282 = vxpose.xlu1.c.b16.start.end [1/1] (short) %v263_v35, 128 }
 0x111   :  { %2109 = vset.pattern.permute.xlu1 %v4437_v4 }
 0x12d   :  { %103 = vperm.xlu1 %2109, %v39_v38  }
 0x156   :  { %v274_v39 = vpop.trf.xlu1 }
 0x157   :  { %1999 = vmatmul.mubr.msk.bf16.vlgmr.msra.gmra.mrb[0].mxu1 %vm298_vm2, %v274_v39 }
 0x158   :  { %396 = vmatprep.mubr.bf16.mxu1 %v4437_v4 }
 0x15a   :  { %v275_v40 = vpop.trf.xlu1 }
 0x15e   :  { %v276_v41 = vpop.trf.xlu1 }
 0x15f   :  { %2000 = vmatmul.mubr.msk.bf16.gmra.mrb[4].mxu1 %vm298_vm2, %v275_v40 }
 0x160   :  { %406 = vmatprep.mubr.bf16.mxu1 %v4437_v4 }
 0x162   :  { %v277_v42 = vpop.trf.xlu1 }
 0x166   :  { %v278_v43 = vpop.trf.xlu1 }
 0x167   :  { %2001 = vmatmul.mubr.msk.bf16.gmra.mrb[8].mxu1 %vm298_vm2, %v276_v41 }
 0x168   :  { %416 = vmatprep.mubr.bf16.mxu1 %v4437_v4 }
 0x16a   :  { %v279_v44 = vpop.trf.xlu1 }
 0x16e   :  { %v280_v48 = vpop.trf.xlu1 }
 0x16f   :  { %2002 = vmatmul.mubr.msk.bf16.gmra.mrb[12].mxu1 %vm298_vm2, %v277_v42 }
 0x170   :  { %426 = vmatprep.mubr.bf16.mxu1 %v4437_v4 }
 0x172   :  { %v281_v49 = vpop.trf.xlu1 }
 0x176   :  { %v290_v50 = vpop.trf.xlu1 }
 0x177   :  { %2003 = vmatmul.mubr.msk.bf16.gmra.mrb[16].mxu1 %vm298_vm2, %v278_v43 }
 0x178   :  { %436 = vmatprep.mubr.bf16.mxu1 %v4437_v4 }
 0x17a   :  { %v291_v51 = vpop.trf.xlu1 }
 0x17e   :  { %v292_v52 = vpop.trf.xlu1 }
 0x17f   :  { %2004 = vmatmul.mubr.msk.bf16.gmra.mrb[20].mxu1 %vm298_vm2, %v279_v44 }
 0x180   :  { %446 = vmatprep.mubr.bf16.mxu1 %v4437_v4 }
 0x182   :  { %v293_v54 = vpop.trf.xlu1 }
 0x186   :  { %v294_v55 = vpop.trf.xlu1 }
 0x187   :  { %2005 = vmatmul.mubr.msk.bf16.gmra.mrb[24].mxu1 %vm298_vm2, %v280_v48 }
 0x188   :  { %456 = vmatprep.mubr.bf16.mxu1 %v4437_v4 }
 0x18a   :  { %v295_v56 = vpop.trf.xlu1 }
 0x18e   :  { %v296_v57 = vpop.trf.xlu1 }
 0x18f   :  { %2006 = vmatmul.mubr.msk.bf16.gmra.mrb[28].mxu1 %vm298_vm2, %v281_v49 }
 0x190   :  { %466 = vmatprep.mubr.bf16.mxu1 %v4437_v4 }
 0x192   :  { %v297_v58 = vpop.trf.xlu1 }
 0x197   :  { %2007 = vmatmul.mubr.msk.bf16.gmra.mrb[32].mxu1 %vm298_vm2, %v290_v50 }
 0x198   :  { %476 = vmatprep.mubr.bf16.mxu1 %v4437_v4 }
 0x19f   :  { %2008 = vmatmul.mubr.msk.bf16.gmra.mrb[36].mxu1 %vm298_vm2, %v291_v51 }
 0x1a0   :  { %486 = vmatprep.mubr.bf16.mxu1 %v4437_v4 }
 0x1a7   :  { %2009 = vmatmul.mubr.msk.bf16.gmra.mrb[40].mxu1 %vm298_vm2, %v292_v52 }
 0x1a8   :  { %496 = vmatprep.mubr.bf16.mxu1 %v4437_v4 }
 0x1ac   :  { %v2662_v60 = vpop.permute.xlu1 %103 }
 0x1ad   :  { %4594 = vst [vmem:[#allocation22_spill] sm:$0xff] %v2662_v60  ;;  %v2671_v2 = vadd.f32 %v257_v36, %v2662_v60  ;;  %v2674_v5 = vadd.f32 %v259_v37, %v2662_v60 }
 0x1af   :  { %4597 = vst [vmem:[#allocation25_spill] sm:$0xff] %v2671_v2  ;;  %4598 = vst [vmem:[#allocation26_spill] sm:$0xff] %v2674_v5  ;;  %2010 = vmatmul.mubr.msk.bf16.gmra.mrb[44].mxu1 %vm298_vm2, %v293_v54 }
 0x1b0   :  { %506 = vmatprep.mubr.bf16.mxu1 %v4437_v4 }
 0x1b7   :  { %2011 = vmatmul.mubr.msk.bf16.gmra.mrb[48].mxu1 %vm298_vm2, %v294_v55 }
 0x1b8   :  { %516 = vmatprep.mubr.bf16.mxu1 %v4437_v4 }
 0x1bf   :  { %2012 = vmatmul.mubr.msk.bf16.gmra.mrb[52].mxu1 %vm298_vm2, %v295_v56 }
 0x1c0   :  { %526 = vmatprep.mubr.bf16.mxu1 %v4437_v4 }
 0x1c7   :  { %2013 = vmatmul.mubr.msk.bf16.gmra.mrb[56].mxu1 %vm298_vm2, %v296_v57 }
 0x1c8   :  { %536 = vmatprep.mubr.bf16.mxu1 %v4437_v4 }
 0x1cf   :  { %2014 = vmatmul.mubr.msk.bf16.gmra.mrb[60].mxu1 %vm298_vm2, %v297_v58 }
 0x1d0   :  { %1317 = vmatprep.mubr.bf16.mxu1 %v4437_v4 }
 0x22a   :  { %v2690_v10 = vpop.f32.mrb[0].mxu1 }
 0x22b   :  { %v2692_v11 = vpop.f32.mrb[1].mxu1 }
 0x22c   :  { %v2694_v12 = vpop.f32.mrb[2].mxu1 }
 0x22d   :  { %v2696_v15 = vpop.f32.mrb[3].mxu1 }
 0x232   :  { %v2698_v21 = vpop.f32.mrb[4].mxu1 }
 0x233   :  { %v547_v22 = vmax.f32 %v2690_v10, %v2698_v21  ;;  %v2702_v24 = vpop.f32.mrb[5].mxu1 }
 0x234   :  { %v584_v27 = vmax.f32 %v2692_v11, %v2702_v24  ;;  %v2706_v31 = vpop.f32.mrb[6].mxu1 }
 0x235   :  { %v548_v33 = vmax.f32 %v2694_v12, %v2706_v31  ;;  %v2710_v34 = vpop.f32.mrb[7].mxu1 }
 0x236   :  { %v585_v35 = vmax.f32 %v2696_v15, %v2710_v34 }
 0x23a   :  { %v2714_v36 = vpop.f32.mrb[8].mxu1 }
 0x23b   :  { %v549_v37 = vmax.f32 %v547_v22, %v2714_v36  ;;  %v2717_v38 = vpop.f32.mrb[9].mxu1 }
 0x23c   :  { %v586_v39 = vmax.f32 %v584_v27, %v2717_v38  ;;  %v2720_v40 = vpop.f32.mrb[10].mxu1 }
 0x23d   :  { %v550_v41 = vmax.f32 %v548_v33, %v2720_v40  ;;  %v2723_v42 = vpop.f32.mrb[11].mxu1 }
 0x23e   :  { %v587_v43 = vmax.f32 %v585_v35, %v2723_v42 }
 0x242   :  { %v2726_v44 = vpop.f32.mrb[12].mxu1 }
 0x243   :  { %v551_v48 = vmax.f32 %v549_v37, %v2726_v44  ;;  %v2729_v49 = vpop.f32.mrb[13].mxu1 }
 0x244   :  { %v588_v50 = vmax.f32 %v586_v39, %v2729_v49  ;;  %v2732_v51 = vpop.f32.mrb[14].mxu1 }
 0x245   :  { %v552_v52 = vmax.f32 %v550_v41, %v2732_v51  ;;  %v2735_v54 = vpop.f32.mrb[15].mxu1 }
 0x246   :  { %v589_v55 = vmax.f32 %v587_v43, %v2735_v54 }
 0x24a   :  { %v2738_v56 = vpop.f32.mrb[16].mxu1 }
 0x24b   :  { %v553_v57 = vmax.f32 %v551_v48, %v2738_v56  ;;  %v2741_v58 = vpop.f32.mrb[17].mxu1 }
 0x24c   :  { %v590_v22 = vmax.f32 %v588_v50, %v2741_v58  ;;  %v2744_v27 = vpop.f32.mrb[18].mxu1 }
 0x24d   :  { %v554_v33 = vmax.f32 %v552_v52, %v2744_v27  ;;  %v2747_v35 = vpop.f32.mrb[19].mxu1 }
 0x24e   :  { %v591_v37 = vmax.f32 %v589_v55, %v2747_v35 }
 0x252   :  { %v2750_v39 = vpop.f32.mrb[20].mxu1 }
 0x253   :  { %v555_v41 = vmax.f32 %v553_v57, %v2750_v39  ;;  %v2753_v43 = vpop.f32.mrb[21].mxu1 }
 0x254   :  { %v592_v48 = vmax.f32 %v590_v22, %v2753_v43  ;;  %v2756_v4 = vpop.f32.mrb[22].mxu1 }
 0x255   :  { %v556_v50 = vmax.f32 %v554_v33, %v2756_v4  ;;  %v2759_v3 = vpop.f32.mrb[23].mxu1 }
 0x256   :  { %4599 = vst [vmem:[#allocation27_spill] sm:$0xff] %v2759_v3  ;;  %v593_v52 = vmax.f32 %v591_v37, %v2759_v3 }
 0x25a   :  { %v2762_v9 = vpop.f32.mrb[24].mxu1 }
 0x25b   :  { %v557_v55 = vmax.f32 %v555_v41, %v2762_v9  ;;  %v2765_v6 = vpop.f32.mrb[25].mxu1 }
 0x25c   :  { %4600 = vst [vmem:[#allocation28_spill] sm:$0xff] %v2765_v6  ;;  %v594_v57 = vmax.f32 %v592_v48, %v2765_v6  ;;  %v2768_v30 = vpop.f32.mrb[26].mxu1 }
 0x25d   :  { %v558_v22 = vmax.f32 %v556_v50, %v2768_v30  ;;  %v2771_v32 = vpop.f32.mrb[27].mxu1 }
 0x25e   :  { %4601 = vst [vmem:[#allocation29_spill] sm:$0xff] %v2771_v32  ;;  %v595_v33 = vmax.f32 %v593_v52, %v2771_v32 }
 0x262   :  { %v2774_v19 = vpop.f32.mrb[28].mxu1 }
 0x263   :  { %v559_v37 = vmax.f32 %v557_v55, %v2774_v19  ;;  %v2777_v20 = vpop.f32.mrb[29].mxu1 }
 0x264   :  { %4602 = vst [vmem:[#allocation30_spill] sm:$0xff] %v2777_v20  ;;  %v596_v41 = vmax.f32 %v594_v57, %v2777_v20  ;;  %v2780_v7 = vpop.f32.mrb[30].mxu1 }
 0x265   :  { %v560_v48 = vmax.f32 %v558_v22, %v2780_v7  ;;  %v2783_v60 = vpop.f32.mrb[31].mxu1 }
 0x266   :  { %4603 = vst [vmem:[#allocation31_spill] sm:$0xff] %v2783_v60  ;;  %v597_v50 = vmax.f32 %v595_v33, %v2783_v60 }
 0x26a   :  { %v2786_v59 = vpop.f32.mrb[32].mxu1 }
 0x26b   :  { %v561_v52 = vmax.f32 %v559_v37, %v2786_v59  ;;  %v2789_v23 = vpop.f32.mrb[33].mxu1 }
 0x26c   :  { %4604 = vst [vmem:[#allocation32_spill] sm:$0xff] %v2789_v23  ;;  %v598_v55 = vmax.f32 %v596_v41, %v2789_v23  ;;  %v2792_v16 = vpop.f32.mrb[34].mxu1 }
 0x26d   :  { %v562_v57 = vmax.f32 %v560_v48, %v2792_v16  ;;  %v2795_v8 = vpop.f32.mrb[35].mxu1 }
 0x26e   :  { %4605 = vst [vmem:[#allocation33_spill] sm:$0xff] %v2795_v8  ;;  %v599_v22 = vmax.f32 %v597_v50, %v2795_v8 }
 0x272   :  { %v2798_v62 = vpop.f32.mrb[36].mxu1 }
 0x273   :  { %v563_v33 = vmax.f32 %v561_v52, %v2798_v62  ;;  %v2801_v53 = vpop.f32.mrb[37].mxu1 }
 0x274   :  { %4606 = vst [vmem:[#allocation34_spill] sm:$0xff] %v2801_v53  ;;  %v600_v37 = vmax.f32 %v598_v55, %v2801_v53  ;;  %v2804_v47 = vpop.f32.mrb[38].mxu1 }
 0x275   :  { %v564_v41 = vmax.f32 %v562_v57, %v2804_v47  ;;  %v2807_v45 = vpop.f32.mrb[39].mxu1 }
 0x276   :  { %4607 = vst [vmem:[#allocation35_spill] sm:$0xff] %v2807_v45  ;;  %v601_v48 = vmax.f32 %v599_v22, %v2807_v45 }
 0x27a   :  { %v2810_v46 = vpop.f32.mrb[40].mxu1 }
 0x27b   :  { %v565_v50 = vmax.f32 %v563_v33, %v2810_v46  ;;  %v2813_v61 = vpop.f32.mrb[41].mxu1 }
 0x27c   :  { %4608 = vst [vmem:[#allocation36_spill] sm:$0xff] %v2813_v61  ;;  %v602_v52 = vmax.f32 %v600_v37, %v2813_v61  ;;  %v2816_v2 = vpop.f32.mrb[42].mxu1 }
 0x27d   :  { %v566_v55 = vmax.f32 %v564_v41, %v2816_v2  ;;  %v2819_v63 = vpop.f32.mrb[43].mxu1 }
 0x27e   :  { %4609 = vst [vmem:[#allocation37_spill] sm:$0xff] %v2819_v63  ;;  %v603_v57 = vmax.f32 %v601_v48, %v2819_v63 }
 0x282   :  { %v2822_v5 = vpop.f32.mrb[44].mxu1 }
 0x283   :  { %v567_v22 = vmax.f32 %v565_v50, %v2822_v5  ;;  %v2825_v25 = vpop.f32.mrb[45].mxu1 }
 0x284   :  { %4610 = vst [vmem:[#allocation38_spill] sm:$0xff] %v2825_v25  ;;  %v604_v33 = vmax.f32 %v602_v52, %v2825_v25  ;;  %v2828_v26 = vpop.f32.mrb[46].mxu1 }
 0x285   :  { %v568_v37 = vmax.f32 %v566_v55, %v2828_v26  ;;  %v2831_v28 = vpop.f32.mrb[47].mxu1 }
 0x286   :  { %4611 = vst [vmem:[#allocation39_spill] sm:$0xff] %v2831_v28  ;;  %v605_v41 = vmax.f32 %v603_v57, %v2831_v28 }
 0x28a   :  { %v2834_v29 = vpop.f32.mrb[48].mxu1 }
 0x28b   :  { %v569_v48 = vmax.f32 %v567_v22, %v2834_v29  ;;  %v2837_v13 = vpop.f32.mrb[49].mxu1 }
 0x28c   :  { %4612 = vst [vmem:[#allocation40_spill] sm:$0xff] %v2837_v13  ;;  %v606_v50 = vmax.f32 %v604_v33, %v2837_v13  ;;  %v2840_v14 = vpop.f32.mrb[50].mxu1 }
 0x28d   :  { %v570_v52 = vmax.f32 %v568_v37, %v2840_v14  ;;  %v2843_v17 = vpop.f32.mrb[51].mxu1 }
 0x28e   :  { %4613 = vst [vmem:[#allocation41_spill] sm:$0xff] %v2843_v17  ;;  %v607_v55 = vmax.f32 %v605_v41, %v2843_v17 }
 0x292   :  { %v2846_v18 = vpop.f32.mrb[52].mxu1 }
 0x293   :  { %v571_v57 = vmax.f32 %v569_v48, %v2846_v18  ;;  %v2849_v0 = vpop.f32.mrb[53].mxu1 }
 0x294   :  { %4614 = vst [vmem:[#allocation42_spill] sm:$0xff] %v2849_v0  ;;  %v608_v22 = vmax.f32 %v606_v50, %v2849_v0  ;;  %v2852_v1 = vpop.f32.mrb[54].mxu1 }
 0x295   :  { %v572_v33 = vmax.f32 %v570_v52, %v2852_v1  ;;  %v2855_v13 = vpop.f32.mrb[55].mxu1 }
 0x296   :  { %4615 = vst [vmem:[#allocation43_spill] sm:$0xff] %v2855_v13  ;;  %v609_v37 = vmax.f32 %v607_v55, %v2855_v13 }
 0x29a   :  { %v2858_v28 = vpop.f32.mrb[56].mxu1 }
 0x29b   :  { %v573_v41 = vmax.f32 %v571_v57, %v2858_v28  ;;  %v2861_v17 = vpop.f32.mrb[57].mxu1 }
 0x29c   :  { %4616 = vst [vmem:[#allocation44_spill] sm:$0xff] %v2861_v17  ;;  %v610_v48 = vmax.f32 %v608_v22, %v2861_v17  ;;  %v2864_v25 = vpop.f32.mrb[58].mxu1 }
 0x29d   :  { %v574_v50 = vmax.f32 %v572_v33, %v2864_v25  ;;  %v2867_v0 = vpop.f32.mrb[59].mxu1 }
 0x29e   :  { %4617 = vst [vmem:[#allocation45_spill] sm:$0xff] %v2867_v0  ;;  %v611_v52 = vmax.f32 %v609_v37, %v2867_v0 }
 0x2a2   :  { %v2870_v63 = vpop.f32.mrb[60].mxu1 }
 0x2a3   :  { %v575_v55 = vmax.f32 %v573_v41, %v2870_v63  ;;  %v2873_v13 = vpop.f32.mrb[61].mxu1 }
 0x2a4   :  { %4618 = vst [vmem:[#allocation46_spill] sm:$0xff] %v2873_v13  ;;  %v612_v57 = vmax.f32 %v610_v48, %v2873_v13  ;;  %v2876_v61 = vpop.f32.mrb[62].mxu1 }
 0x2a5   :  { %v576_v22 = vmax.f32 %v574_v50, %v2876_v61  ;;  %v2879_v17 = vpop.f32.mrb[63].mxu1 }
 0x2a6   :  { %4619 = vst [vmem:[#allocation47_spill] sm:$0xff] %v2879_v17  ;;  %v613_v33 = vmax.f32 %v611_v52, %v2879_v17 }
 0x2a7   :  { %v577_v45 = vmax.f32 %v575_v55, %v576_v22 }
 0x2a8   :  { %v614_v53 = vmax.f32 %v612_v57, %v613_v33 }
 0x2a9   :  { %v578_v8 = vrot.slane %v577_v45, 4 }
 0x2aa   :  { %v615_v37 = vrot.slane %v614_v53, 4 }
 0x2ab   :  { %v579_v0 = vmax.f32 %v577_v45, %v578_v8 }
 0x2ac   :  { %v616_v23 = vmax.f32 %v614_v53, %v615_v37 }
 0x2ad   :  { %v580_v60 = vrot.slane %v579_v0, 2 }
 0x2ae   :  { %v617_v41 = vrot.slane %v616_v23, 2 }
 0x2af   :  { %v581_v20 = vmax.f32 %v579_v0, %v580_v60 }
 0x2b0   :  { %v618_v32 = vmax.f32 %v616_v23, %v617_v41 }
 0x2b1   :  { %v582_v6 = vrot.slane %v581_v20, 1 }
 0x2b2   :  { %v619_v48 = vrot.slane %v618_v32, 1 }
 0x2b3   :  { %v2882_v13 = vmax.f32 %v581_v20, %v582_v6 }
 0x2b4   :  { %v2884_v3 = vmax.f32 %v618_v32, %v619_v48 }
 0x2b5   :  { %v621_v50 = vsub.f32 %v2690_v10, %v2882_v13  ;;  %v623_v52 = vsub.f32 %v2694_v12, %v2882_v13  ;;  %v625_v45 = vsub.f32 %v2698_v21, %v2882_v13  ;;  %v627_v53 = vsub.f32 %v2706_v31, %v2882_v13 }
 0x2b6   :  { %v629_v0 = vsub.f32 %v2714_v36, %v2882_v13  ;;  %v631_v8 = vsub.f32 %v2720_v40, %v2882_v13  ;;  %v633_v20 = vsub.f32 %v2726_v44, %v2882_v13  ;;  %v635_v23 = vsub.f32 %v2732_v51, %v2882_v13 }
 0x2b7   :  { %v637_v32 = vsub.f32 %v2738_v56, %v2882_v13  ;;  %v639_v60 = vsub.f32 %v2744_v27, %v2882_v13  ;;  %v641_v6 = vsub.f32 %v2750_v39, %v2882_v13  ;;  %v643_v10 = vsub.f32 %v2756_v4, %v2882_v13 }
 0x2b8   :  { %v645_v12 = vsub.f32 %v2762_v9, %v2882_v13  ;;  %v647_v21 = vsub.f32 %v2768_v30, %v2882_v13  ;;  %v649_v31 = vsub.f32 %v2774_v19, %v2882_v13  ;;  %v651_v36 = vsub.f32 %v2780_v7, %v2882_v13 }
 0x2b9   :  { %v653_v40 = vsub.f32 %v2786_v59, %v2882_v13  ;;  %v655_v44 = vsub.f32 %v2792_v16, %v2882_v13  ;;  %v657_v4 = vsub.f32 %v2798_v62, %v2882_v13  ;;  %v659_v9 = vsub.f32 %v2804_v47, %v2882_v13  ;;  %v4639_v16 = vld [vmem:[#allocation46_spill] sm:$0xff] }
 0x2ba   :  { %v661_v30 = vsub.f32 %v2810_v46, %v2882_v13  ;;  %v663_v19 = vsub.f32 %v2816_v2, %v2882_v13  ;;  %v665_v7 = vsub.f32 %v2822_v5, %v2882_v13  ;;  %v667_v59 = vsub.f32 %v2828_v26, %v2882_v13 }
 0x2bb   :  { %v685_v56 = vmul.f32 1.442695, %v621_v50  ;;  %v689_v27 = vmul.f32 1.442695, %v623_v52  ;;  %v693_v39 = vmul.f32 1.442695, %v625_v45 }
 0x2bc   :  { %v697_v57 = vmul.f32 1.442695, %v627_v53  ;;  %v701_v33 = vmul.f32 1.442695, %v629_v0  ;;  %v705_v37 = vmul.f32 1.442695, %v631_v8 }
 0x2bd   :  { %2110 = vpow2.f32 %v685_v56  ;;  %v709_v41 = vmul.f32 1.442695, %v633_v20  ;;  %v713_v48 = vmul.f32 1.442695, %v635_v23  ;;  %v717_v26 = vmul.f32 1.442695, %v637_v32 }
 0x2be   :  { %2112 = vpow2.f32 %v689_v27  ;;  %v721_v51 = vmul.f32 1.442695, %v639_v60  ;;  %v725_v50 = vmul.f32 1.442695, %v641_v6  ;;  %v729_v52 = vmul.f32 1.442695, %v643_v10 }
 0x2bf   :  { %2114 = vpow2.f32 %v693_v39  ;;  %v733_v45 = vmul.f32 1.442695, %v645_v12  ;;  %v737_v55 = vmul.f32 1.442695, %v647_v21  ;;  %v741_v53 = vmul.f32 1.442695, %v649_v31 }
 0x2c0   :  { %2116 = vpow2.f32 %v697_v57  ;;  %v745_v5 = vmul.f32 1.442695, %v651_v36  ;;  %v749_v22 = vmul.f32 1.442695, %v653_v40  ;;  %v753_v56 = vmul.f32 1.442695, %v655_v44 }
 0x2c1   :  { %2118 = vpow2.f32 %v701_v33  ;;  %v757_v0 = vmul.f32 1.442695, %v657_v4  ;;  %v761_v8 = vmul.f32 1.442695, %v659_v9  ;;  %v765_v27 = vmul.f32 1.442695, %v661_v30 }
 0x2c2   :  { %2120 = vpow2.f32 %v705_v37  ;;  %v2954_v20 = vmul.f32 1.442695, %v663_v19  ;;  %v2956_v23 = vmul.f32 1.442695, %v665_v7  ;;  %v2958_v32 = vmul.f32 1.442695, %v667_v59 }
 0x2c3   :  { %2122 = vpow2.f32 %v709_v41  ;;  %v4620_v30 = vld [vmem:[#allocation27_spill] sm:$0xff]  ;;  %v4622_v39 = vld [vmem:[#allocation29_spill] sm:$0xff]  ;;  %v4623_v37 = vld [vmem:[#allocation30_spill] sm:$0xff] }
 0x2c4   :  { %2124 = vpow2.f32 %v713_v48  ;;  %v4624_v48 = vld [vmem:[#allocation31_spill] sm:$0xff]  ;;  %v4626_v9 = vld [vmem:[#allocation33_spill] sm:$0xff]  ;;  %v4627_v4 = vld [vmem:[#allocation34_spill] sm:$0xff] }
 0x2c5   :  { %2126 = vpow2.f32 %v717_v26  ;;  %v4621_v26 = vld [vmem:[#allocation28_spill] sm:$0xff]  ;;  %v4628_v41 = vld [vmem:[#allocation35_spill] sm:$0xff]  ;;  %v4630_v31 = vld [vmem:[#allocation37_spill] sm:$0xff] }
 0x2c6   :  { %2128 = vpow2.f32 %v721_v51  ;;  %v4629_v36 = vld [vmem:[#allocation36_spill] sm:$0xff]  ;;  %v4631_v57 = vld [vmem:[#allocation38_spill] sm:$0xff]  ;;  %v4632_v10 = vld [vmem:[#allocation39_spill] sm:$0xff] }
 0x2c7   :  { %v2968_v21 = vpop.eup %2110  ;;  %2130 = vpow2.f32 %v725_v50  ;;  %v4633_v50 = vld [vmem:[#allocation40_spill] sm:$0xff]  ;;  %v4634_v60 = vld [vmem:[#allocation41_spill] sm:$0xff] }
 0x2c8   :  { %v2976_v44 = vpop.eup %2112  ;;  %2132 = vpow2.f32 %v729_v52  ;;  %v4625_v52 = vld [vmem:[#allocation32_spill] sm:$0xff] }
 0x2c9   :  { %v2984_v7 = vpop.eup %2114  ;;  %2134 = vpow2.f32 %v733_v45  ;;  %v813_v59 = vadd.f32 %v2976_v44, %v2968_v21  ;;  %v4638_v45 = vld [vmem:[#allocation45_spill] sm:$0xff] }
 0x2ca   :  { %v2992_v33 = vpop.eup %2116  ;;  %2136 = vpow2.f32 %v737_v55  ;;  %v4636_v55 = vld [vmem:[#allocation43_spill] sm:$0xff] }
 0x2cb   :  { %v3000_v19 = vpop.eup %2118  ;;  %2138 = vpow2.f32 %v741_v53  ;;  %v814_v51 = vadd.f32 %v2984_v7, %v813_v59 }
 0x2cc   :  { %v3007_v40 = vpop.eup %2120  ;;  %2140 = vpow2.f32 %v745_v5 }
 0x2cd   :  { %v3015_v12 = vpop.eup %2122  ;;  %2142 = vpow2.f32 %v749_v22  ;;  %v815_v59 = vadd.f32 %v2992_v33, %v814_v51 }
 0x2ce   :  { %v3022_v6 = vpop.eup %2124  ;;  %2144 = vpow2.f32 %v753_v56 }
 0x2cf   :  { %v3030_v46 = vpop.eup %2126  ;;  %2146 = vpow2.f32 %v757_v0  ;;  %v816_v51 = vadd.f32 %v3000_v19, %v815_v59  ;;  %v4640_v59 = vsub.f32 %v2834_v29, %v2882_v13 }
 0x2d0   :  { %v3037_v62 = vpop.eup %2128  ;;  %2148 = vpow2.f32 %v761_v8  ;;  %v4641_v8 = vsub.f32 %v2840_v14, %v2882_v13 }
 0x2d1   :  { %v3045_v2 = vpop.eup %2130  ;;  %2150 = vpow2.f32 %v765_v27  ;;  %v781_v5 = vmul.f32 1.442695, %v4640_v59  ;;  %v817_v56 = vadd.f32 %v3007_v40, %v816_v51  ;;  %v4642_v27 = vsub.f32 %v2846_v18, %v2882_v13 }
 0x2d2   :  { %v3051_v47 = vpop.eup %2132  ;;  %2152 = vpow2.f32 %v2954_v20  ;;  %v785_v22 = vmul.f32 1.442695, %v4641_v8  ;;  %v4643_v20 = vsub.f32 %v2852_v1, %v2882_v13  ;;  %v4647_v1 = vsub.f32 %v2870_v63, %v2882_v13 }
 0x2d3   :  { %v3057_v53 = vpop.eup %2134  ;;  %2154 = vpow2.f32 %v2956_v23  ;;  %v789_v0 = vmul.f32 1.442695, %v4642_v27  ;;  %v818_v29 = vadd.f32 %v3015_v12, %v817_v56  ;;  %v4644_v23 = vsub.f32 %v2858_v28, %v2882_v13 }
 0x2d4   :  { %v3064_v59 = vpop.eup %2136  ;;  %2156 = vpow2.f32 %v2958_v32  ;;  %v793_v51 = vmul.f32 1.442695, %v4643_v20  ;;  %v4645_v56 = vsub.f32 %v2864_v25, %v2882_v13 }
 0x2d5   :  { %v3070_v14 = vpop.eup %2138  ;;  %2158 = vpow2.f32 %v781_v5  ;;  %v797_v8 = vmul.f32 1.442695, %v4644_v23  ;;  %v819_v18 = vadd.f32 %v3022_v6, %v818_v29  ;;  %v805_v5 = vmul.f32 1.442695, %v4647_v1 }
 0x2d6   :  { %v3076_v27 = vpop.eup %2140  ;;  %2160 = vpow2.f32 %v785_v22  ;;  %v801_v32 = vmul.f32 1.442695, %v4645_v56  ;;  %v4648_v29 = vsub.f32 %v2876_v61, %v2882_v13  ;;  %v4651_v13 = vsub.f32 %v2702_v24, %v2884_v3 }
 0x2d7   :  { %v3081_v17 = vpop.eup %2142  ;;  %2162 = vpow2.f32 %v789_v0  ;;  %v820_v20 = vadd.f32 %v3030_v46, %v819_v18  ;;  %v4649_v0 = vsub.f32 %v2692_v11, %v2884_v3  ;;  %v4650_v18 = vsub.f32 %v2696_v15, %v2884_v3 }
 0x2d8   :  { %4646 = vst [vmem:[#allocation27_spill] sm:$0xff] %v3081_v17  ;;  %v3087_v28 = vpop.eup %2144  ;;  %2164 = vpow2.f32 %v793_v51  ;;  %v809_v22 = vmul.f32 1.442695, %v4648_v29  ;;  %v695_v61 = vmul.f32 1.442695, %v4651_v13  ;;  %v4652_v11 = vsub.f32 %v2710_v34, %v2884_v3 }
 0x2d9   :  { %v3092_v23 = vpop.eup %2146  ;;  %2166 = vpow2.f32 %v797_v8  ;;  %v821_v25 = vadd.f32 %v3037_v62, %v820_v20  ;;  %v687_v56 = vmul.f32 1.442695, %v4649_v0  ;;  %v691_v51 = vmul.f32 1.442695, %v4650_v18 }
 0x2da   :  { %v3098_v63 = vpop.eup %2148  ;;  %2168 = vpow2.f32 %v801_v32  ;;  %v699_v20 = vmul.f32 1.442695, %v4652_v11  ;;  %v4653_v32 = vsub.f32 %v2717_v38, %v2884_v3  ;;  %v4654_v15 = vsub.f32 %v2723_v42, %v2884_v3 }
 0x2db   :  { %v3106_v1 = vpop.eup %2150  ;;  %2170 = vpow2.f32 %v805_v5  ;;  %v822_v8 = vadd.f32 %v3045_v2, %v821_v25  ;;  %v4655_v5 = vsub.f32 %v2729_v49, %v2884_v3  ;;  %v4656_v25 = vsub.f32 %v2735_v54, %v2884_v3 }
 0x2dc   :  { %v703_v29 = vmul.f32 1.442695, %v4653_v32  ;;  %v3115_v0 = vpop.eup %2152  ;;  %2172 = vpow2.f32 %v809_v22  ;;  %v707_v24 = vmul.f32 1.442695, %v4654_v15  ;;  %v4657_v22 = vsub.f32 %v2741_v58, %v2884_v3 }
 0x2dd   :  { %v711_v18 = vmul.f32 1.442695, %v4655_v5  ;;  %v715_v34 = vmul.f32 1.442695, %v4656_v25  ;;  %v3126_v13 = vpop.eup %2154  ;;  %v823_v38 = vadd.f32 %v3051_v47, %v822_v8  ;;  %2174 = vpow2.f32 %v687_v56 }
 0x2de   :  { %v719_v11 = vmul.f32 1.442695, %v4657_v22  ;;  %v4658_v42 = vsub.f32 %v2747_v35, %v2884_v3  ;;  %v3135_v15 = vpop.eup %2156  ;;  %2176 = vpow2.f32 %v691_v51 }
 0x2df   :  { %v3143_v8 = vpop.eup %2158  ;;  %v824_v58 = vadd.f32 %v3057_v53, %v823_v38  ;;  %2178 = vpow2.f32 %v695_v61 }
 0x2e0   :  { %v723_v32 = vmul.f32 1.442695, %v4658_v42  ;;  %v3150_v5 = vpop.eup %2160  ;;  %2180 = vpow2.f32 %v699_v20  ;;  %v4659_v20 = vsub.f32 %v2753_v43, %v2884_v3  ;;  %v4660_v42 = vsub.f32 %v4620_v30, %v2884_v3 }
 0x2e1   :  { %v3158_v38 = vpop.eup %2162  ;;  %v825_v61 = vadd.f32 %v3064_v59, %v824_v58  ;;  %2182 = vpow2.f32 %v703_v29 }
 0x2e2   :  { %v3165_v35 = vpop.eup %2164  ;;  %2184 = vpow2.f32 %v707_v24  ;;  %v727_v51 = vmul.f32 1.442695, %v4659_v20  ;;  %v731_v22 = vmul.f32 1.442695, %v4660_v42 }
 0x2e3   :  { %v3173_v58 = vpop.eup %2166  ;;  %v826_v29 = vadd.f32 %v3070_v14, %v825_v61  ;;  %2186 = vpow2.f32 %v711_v18  ;;  %v4661_v18 = vsub.f32 %v4621_v26, %v2884_v3  ;;  %v4666_v26 = vsub.f32 %v4626_v9, %v2884_v3 }
 0x2e4   :  { %v3181_v56 = vpop.eup %2168  ;;  %2188 = vpow2.f32 %v715_v34  ;;  %v4662_v34 = vsub.f32 %v4622_v39, %v2884_v3  ;;  %v4665_v39 = vsub.f32 %v4625_v52, %v2884_v3  ;;  %v4669_v9 = vsub.f32 %v4629_v36, %v2884_v3 }
 0x2e5   :  { %v3186_v25 = vpop.eup %2170  ;;  %v827_v54 = vadd.f32 %v3076_v27, %v826_v29  ;;  %2190 = vpow2.f32 %v719_v11  ;;  %v735_v43 = vmul.f32 1.442695, %v4661_v18  ;;  %v4663_v11 = vsub.f32 %v4623_v37, %v2884_v3 }
 0x2e6   :  { %v3194_v20 = vpop.eup %2172  ;;  %2192 = vpow2.f32 %v723_v32  ;;  %v739_v30 = vmul.f32 1.442695, %v4662_v34  ;;  %v4664_v32 = vsub.f32 %v4624_v48, %v2884_v3  ;;  %v751_v34 = vmul.f32 1.442695, %v4665_v39 }
 0x2e7   :  { %v2175_v42 = vpop.eup %2174  ;;  %v828_v24 = vadd.f32 %v3081_v17, %v827_v54  ;;  %2194 = vpow2.f32 %v727_v51  ;;  %v743_v29 = vmul.f32 1.442695, %v4663_v11  ;;  %v4667_v48 = vsub.f32 %v4627_v4, %v2884_v3 }
 0x2e8   :  { %v2177_v18 = vpop.eup %2176  ;;  %2196 = vpow2.f32 %v731_v22  ;;  %v747_v61 = vmul.f32 1.442695, %v4664_v32  ;;  %v755_v22 = vmul.f32 1.442695, %v4666_v26  ;;  %v767_v26 = vmul.f32 1.442695, %v4669_v9 }
 0x2e9   :  { %v2179_v49 = vpop.eup %2178  ;;  %v829_v54 = vadd.f32 %v3087_v28, %v828_v24  ;;  %2198 = vpow2.f32 %v735_v43  ;;  %v850_v51 = vadd.f32 %v2177_v18, %v2175_v42  ;;  %v896_v37 = vpack.c.bf16 %v2177_v18, %v2175_v42 }
 0x2ea   :  { %v2181_v11 = vpop.eup %2180  ;;  %2200 = vpow2.f32 %v739_v30  ;;  %v759_v32 = vmul.f32 1.442695, %v4667_v48  ;;  %v4668_v30 = vsub.f32 %v4628_v41, %v2884_v3  ;;  %v4670_v4 = vpack.c.bf16 %v2976_v44, %v2968_v21 }
 0x2eb   :  { %v2183_v17 = vpop.eup %2182  ;;  %v830_v52 = vadd.f32 %v3092_v23, %v829_v54  ;;  %2202 = vpow2.f32 %v743_v29  ;;  %v851_v39 = vadd.f32 %v2179_v49, %v850_v51  ;;  %927 = vmatprep.subr.bf16.mxu0 %v896_v37  ;;  %v898_v24 = vpack.c.bf16 %v2181_v11, %v2179_v49 }
 0x2ec   :  { %v2185_v43 = vpop.eup %2184  ;;  %2204 = vpow2.f32 %v747_v61  ;;  %v763_v42 = vmul.f32 1.442695, %v4668_v30  ;;  %928 = vmatpush1.bf16.msra.mxu0 %v4670_v4  ;;  %v4671_v41 = vsub.f32 %v4630_v31, %v2884_v3  ;;  %v4672_v36 = vsub.f32 %v4631_v57, %v2884_v3  ;;  %v4677_v4 = vld [vmem:[#allocation42_spill] sm:$0xff] }
 0x2ed   :  { %v2187_v18 = vpop.eup %2186  ;;  %v831_v29 = vadd.f32 %v3098_v63, %v830_v52  ;;  %2206 = vpow2.f32 %v751_v34  ;;  %v852_v54 = vadd.f32 %v2181_v11, %v851_v39  ;;  %929 = vmatprep.subr.bf16.mxu0 %v898_v24  ;;  %v900_v49 = vpack.c.bf16 %v2185_v43, %v2183_v17 }
 0x2ee   :  { %v2189_v61 = vpop.eup %2188  ;;  %2208 = vpow2.f32 %v755_v22  ;;  %v771_v51 = vmul.f32 1.442695, %v4671_v41  ;;  %v775_v37 = vmul.f32 1.442695, %v4672_v36  ;;  %v4673_v11 = vsub.f32 %v4632_v10, %v2884_v3 }
 0x2ef   :  { %v2191_v48 = vpop.eup %2190  ;;  %v832_v21 = vadd.f32 %v3106_v1, %v831_v29  ;;  %2210 = vpow2.f32 %v759_v32  ;;  %v853_v44 = vadd.f32 %v2183_v17, %v852_v54  ;;  %v902_v52 = vpack.c.bf16 %v2189_v61, %v2187_v18 }
 0x2f0   :  { %v2193_v34 = vpop.eup %2192  ;;  %2212 = vpow2.f32 %v763_v42  ;;  %v779_v22 = vmul.f32 1.442695, %v4673_v11  ;;  %v4674_v31 = vsub.f32 %v4633_v50, %v2884_v3  ;;  %v4675_v57 = vpack.c.bf16 %v2992_v33, %v2984_v7 }
 0x2f1   :  { %v2195_v24 = vpop.eup %2194  ;;  %v833_v30 = vadd.f32 %v3115_v0, %v832_v21  ;;  %2214 = vpow2.f32 %v767_v26  ;;  %v854_v17 = vadd.f32 %v2185_v43, %v853_v44  ;;  %v904_v32 = vpack.c.bf16 %v2193_v34, %v2191_v48 }
 0x2f2   :  { %v783_v39 = vmul.f32 1.442695, %v4674_v31  ;;  %930 = vmatpush1.bf16.msra.mxu0 %v4675_v57  ;;  %v2197_v42 = vpop.eup %2196  ;;  %2216 = vpow2.f32 %v771_v51  ;;  %v4676_v10 = vsub.f32 %v4634_v60, %v2884_v3  ;;  %v4678_v50 = vsub.f32 %v4677_v4, %v2884_v3  ;;  %v4680_v51 = vld [vmem:[#allocation44_spill] sm:$0xff] }
 0x2f3   :  { %931 = vmatprep.subr.bf16.mxu0 %v900_v49  ;;  %v2199_v54 = vpop.eup %2198  ;;  %v834_v7 = vadd.f32 %v3126_v13, %v833_v30  ;;  %2218 = vpow2.f32 %v775_v37  ;;  %v855_v33 = vadd.f32 %v2187_v18, %v854_v17  ;;  %v906_v41 = vpack.c.bf16 %v2197_v42, %v2195_v24 }
 0x2f4   :  { %v787_v9 = vmul.f32 1.442695, %v4676_v10  ;;  %v791_v29 = vmul.f32 1.442695, %v4678_v50  ;;  %v2201_v26 = vpop.eup %2200  ;;  %2220 = vpow2.f32 %v779_v22  ;;  %v4679_v43 = vsub.f32 %v4636_v55, %v2884_v3 }
 0x2f5   :  { %v4681_v60 = vsub.f32 %v4680_v51, %v2884_v3  ;;  %v4682_v21 = vpack.c.bf16 %v3007_v40, %v3000_v19  ;;  %v2203_v44 = vpop.eup %2202  ;;  %v835_v11 = vadd.f32 %v3135_v15, %v834_v7  ;;  %2222 = vpow2.f32 %v783_v39 }
 0x2f6   :  { %v795_v49 = vmul.f32 1.442695, %v4679_v43  ;;  %v856_v18 = vadd.f32 %v2189_v61, %v855_v33  ;;  %v908_v37 = vpack.c.bf16 %v2201_v26, %v2199_v54  ;;  %v2205_v22 = vpop.eup %2204  ;;  %2224 = vpow2.f32 %v787_v9  ;;  %v4685_v61 = vld [vmem:[#allocation47_spill] sm:$0xff] }
 0x2f7   :  { %v799_v36 = vmul.f32 1.442695, %v4681_v60  ;;  %932 = vmatpush1.bf16.msra.mxu0 %v4682_v21  ;;  %v4683_v55 = vsub.f32 %v4638_v45, %v2884_v3  ;;  %v4684_v57 = vsub.f32 %v4639_v16, %v2884_v3  ;;  %v2207_v17 = vpop.eup %2206  ;;  %v836_v40 = vadd.f32 %v3143_v8, %v835_v11 }
 0x2f8   :  { %933 = vmatprep.subr.bf16.mxu0 %v902_v52  ;;  %2226 = vpow2.f32 %v791_v29  ;;  %v857_v19 = vadd.f32 %v2191_v48, %v856_v18  ;;  %v910_v10 = vpack.c.bf16 %v2205_v22, %v2203_v44  ;;  %v2209_v39 = vpop.eup %2208  ;;  %v4686_v52 = vsub.f32 %v4685_v61, %v2884_v3 }
 0x2f9   :  { %v803_v31 = vmul.f32 1.442695, %v4683_v55  ;;  %v807_v30 = vmul.f32 1.442695, %v4684_v57  ;;  %2228 = vpow2.f32 %v795_v49  ;;  %v4687_v45 = vpack.c.bf16 %v3022_v6, %v3015_v12  ;;  %v2211_v4 = vpop.eup %2210 }
 0x2fa   :  { %v811_v9 = vmul.f32 1.442695, %v4686_v52  ;;  %v837_v16 = vadd.f32 %v3150_v5, %v836_v40  ;;  %2230 = vpow2.f32 %v799_v36  ;;  %v858_v50 = vadd.f32 %v2193_v34, %v857_v19  ;;  %v2213_v29 = vpop.eup %2212 }
 0x2fb   :  { %934 = vmatpush1.bf16.msra.mxu0 %v4687_v45  ;;  %v912_v7 = vpack.c.bf16 %v2209_v39, %v2207_v17  ;;  %2232 = vpow2.f32 %v803_v31  ;;  %v2215_v48 = vpop.eup %2214  ;;  %v914_v3 = vpack.c.bf16 %v2213_v29, %v2211_v4  ;;  %v4688_v6 = vpack.c.bf16 %v3037_v62, %v3030_v46 }
 0x2fc   :  { %935 = vmatprep.subr.bf16.mxu0 %v904_v32  ;;  %v838_v33 = vadd.f32 %v3158_v38, %v837_v16  ;;  %2234 = vpow2.f32 %v807_v30  ;;  %v859_v43 = vadd.f32 %v2195_v24, %v858_v50  ;;  %v2217_v49 = vpop.eup %2216  ;;  %v4689_v55 = vpack.c.bf16 %v3051_v47, %v3045_v2 }
 0x2fd   :  { %2236 = vpow2.f32 %v811_v9  ;;  %v2219_v12 = vpop.eup %2218  ;;  %v916_v32 = vpack.c.bf16 %v2217_v49, %v2215_v48  ;;  %v4691_v16 = vpack.c.bf16 %v3076_v27, %v3070_v14  ;;  %v4695_v14 = vpack.c.bf16 %v3115_v0, %v3106_v1 }
 0x2fe   :  { %v839_v51 = vadd.f32 %v3165_v35, %v838_v33  ;;  %v860_v34 = vadd.f32 %v2197_v42, %v859_v43  ;;  %v2221_v60 = vpop.eup %2220  ;;  %v4698_v1 = vpack.c.bf16 %v3165_v35, %v3158_v38  ;;  %v2015_v38 = vld [vmem:[%s4432_s0 + $0x80] sm:$0xff] }
 0x2ff   :  { %936 = vmatpush1.bf16.msra.mxu0 %v4688_v6  ;;  %v2223_v36 = vpop.eup %2222  ;;  %v918_v18 = vpack.c.bf16 %v2221_v60, %v2219_v12 }
 0x300   :  { %937 = vmatprep.subr.bf16.mxu0 %v906_v41  ;;  %v840_v21 = vadd.f32 %v3173_v58, %v839_v51  ;;  %v861_v11 = vadd.f32 %v2199_v54, %v860_v34  ;;  %v2225_v24 = vpop.eup %2224  ;;  %v4690_v54 = vpack.c.bf16 %v3064_v59, %v3057_v53  ;;  %v4692_v53 = vld [vmem:[#allocation27_spill] sm:$0xff]  ;;  %v2021_v34 = vld [vmem:[%s4432_s0 + $0xb0] sm:$0xff] }
 0x301   :  { %v920_v57 = vpack.c.bf16 %v2225_v24, %v2223_v36  ;;  %v4693_v59 = vpack.c.bf16 %v3087_v28, %v4692_v53  ;;  %v4696_v28 = vpack.c.bf16 %v3135_v15, %v3126_v13  ;;  %v2016_v13 = vld [vmem:[%s4432_s0 + $0x88] sm:$0xff]  ;;  %v2018_v15 = vld [vmem:[%s4432_s0 + $0x98] sm:$0xff]  ;;  %v2019_v51 = vld [vmem:[%s4432_s0 + $0xa0] sm:$0xff] }
 0x302   :  { %v2227_v31 = vpop.eup %2226  ;;  %v841_v62 = vadd.f32 %v3181_v56, %v840_v21  ;;  %v862_v46 = vadd.f32 %v2201_v26, %v861_v11  ;;  %v2090_v35 = vpack.c.bf16 %v2018_v15, %v2016_v13  ;;  %v4704_v21 = vld [vmem:[#allocation15_spill] sm:$0xff]  ;;  %v4705_v11 = vld [vmem:[#allocation14_spill] sm:$0xff] }
 0x303   :  { %938 = vmatpush1.bf16.msra.mxu0 %v4689_v55  ;;  %v2229_v42 = vpop.eup %2228 }
 0x304   :  { %939 = vmatprep.subr.bf16.mxu0 %v908_v37  ;;  %v2231_v41 = vpop.eup %2230  ;;  %v842_v30 = vadd.f32 %v3186_v25, %v841_v62  ;;  %v863_v40 = vadd.f32 %v2203_v44, %v862_v46  ;;  %v922_v19 = vpack.c.bf16 %v2229_v42, %v2227_v31  ;;  %v2025_v62 = vld [vmem:[%s4432_s0 + $0xd0] sm:$0xff]  ;;  %v2028_v46 = vld [vmem:[%s4432_s0 + $0xe8] sm:$0xff] }
 0x305   :  { %v2233_v61 = vpop.eup %2232 }
 0x306   :  { %v2235_v52 = vpop.eup %2234  ;;  %v3292_v47 = vadd.f32 %v3194_v20, %v842_v30  ;;  %v864_v2 = vadd.f32 %v2205_v22, %v863_v40  ;;  %v924_v26 = vpack.c.bf16 %v2233_v61, %v2231_v41  ;;  %v4694_v22 = vpack.c.bf16 %v3098_v63, %v3092_v23  ;;  %v2027_v30 = vld [vmem:[%s4432_s0 + $0xe0] sm:$0xff]  ;;  %v2029_v40 = vld [vmem:[%s4432_s0 + $0xf0] sm:$0xff] }
 0x307   :  { %940 = vmatpush1.bf16.msra.mxu0 %v4690_v54  ;;  %v2237_v37 = vpop.eup %2236  ;;  %v4697_v23 = vpack.c.bf16 %v3150_v5, %v3143_v8  ;;  %v4699_v8 = vpack.c.bf16 %v3181_v56, %v3173_v58  ;;  %v2022_v56 = vld [vmem:[%s4432_s0 + $0xb8] sm:$0xff]  ;;  %v4700_v58 = vpack.c.bf16 %v3194_v20, %v3186_v25  ;;  %v4701_v20 = vld [vmem:[#allocation9_spill] sm:$0xff] }
 0x308   :  { %941 = vmatprep.subr.bf16.mxu0 %v910_v10  ;;  %v865_v9 = vadd.f32 %v2207_v17, %v864_v2  ;;  %v926_v45 = vpack.c.bf16 %v2237_v37, %v2235_v52  ;;  %v2026_v25 = vld [vmem:[%s4432_s0 + $0xd8] sm:$0xff]  ;;  %v4711_v2 = vld [vmem:[#allocation19_spill] sm:$0xff] }
 0x30a   :  { %v866_v44 = vadd.f32 %v2209_v39, %v865_v9  ;;  %v4713_v9 = vld [vmem:[#allocation18_spill] sm:$0xff] }
 0x30b   :  { %942 = vmatpush1.bf16.msra.mxu0 %v4691_v16 }
 0x30c   :  { %943 = vmatprep.subr.bf16.mxu0 %v912_v7  ;;  %v867_v50 = vadd.f32 %v2211_v4, %v866_v44  ;;  %v4716_v44 = vld [vmem:[#allocation26_spill] sm:$0xff] }
 0x30e   :  { %v868_v33 = vadd.f32 %v2213_v29, %v867_v50  ;;  %v4717_v50 = vld [vmem:[#allocation24_spill] sm:$0xff] }
 0x30f   :  { %944 = vmatpush1.bf16.msra.mxu0 %v4693_v59  ;;  %v4718_v53 = vpack.c.bf16 %v4716_v44, %v4717_v50  ;;  %v4719_v59 = vld [vmem:[#allocation25_spill] sm:$0xff]  ;;  %v2391_v44 = vld [vmem:[%s4432_s0 + $0x38] sm:$0xff] }
 0x310   :  { %945 = vmatprep.subr.bf16.mxu0 %v914_v3  ;;  %v869_v43 = vadd.f32 %v2215_v48, %v868_v33  ;;  %v2017_v3 = vld [vmem:[%s4432_s0 + $0x90] sm:$0xff]  ;;  %v4720_v33 = vld [vmem:[#allocation23_spill] sm:$0xff] }
 0x311   :  { %v2092_v6 = vpack.c.bf16 %v2017_v3, %v2015_v38 }
 0x312   :  { %v870_v17 = vadd.f32 %v2217_v49, %v869_v43  ;;  %v2020_v49 = vld [vmem:[%s4432_s0 + $0xa8] sm:$0xff]  ;;  %v4721_v43 = vpack.c.bf16 %v4719_v59, %v4720_v33 }
 0x313   :  { %946 = vmatpush1.bf16.msra.mxu0 %v4694_v22  ;;  %v4722_v22 = vmov 0.0  }
 0x314   :  { %947 = vmatprep.subr.bf16.mxu0 %v916_v32  ;;  %v871_v10 = vadd.f32 %v2219_v12, %v870_v17  ;;  %v2094_v12 = vpack.c.bf16 %v2022_v56, %v2020_v49  ;;  %v2024_v32 = vld [vmem:[%s4432_s0 + $0xc8] sm:$0xff]  ;;  %v2374_v17 = vld [vmem:[%s4434_s1] sm:$0xff] }
 0x315   :  { %v2098_v55 = vpack.c.bf16 %v2026_v25, %v2024_v32 }
 0x316   :  { %v872_v27 = vadd.f32 %v2221_v60, %v871_v10  ;;  %v4702_v60 = vld [vmem:[#allocation8_spill] sm:$0xff] }
 0x317   :  { %948 = vmatpush1.bf16.msra.mxu0 %v4695_v14  ;;  %v2375_v10 = vld [vmem:[%s4434_s1 + $0x8] sm:$0xff]  ;;  %v2376_v14 = vld [vmem:[%s4434_s1 + $0x10] sm:$0xff] }
 0x318   :  { %949 = vmatprep.subr.bf16.mxu0 %v918_v18  ;;  %v873_v39 = vadd.f32 %v2223_v36, %v872_v27  ;;  %v4703_v36 = vpack.c.bf16 %v4701_v20, %v4702_v60  ;;  %v4706_v18 = vpack.c.bf16 %v4704_v21, %v4705_v11  ;;  %v2377_v27 = vld [vmem:[%s4434_s1 + $0x18] sm:$0xff]  ;;  %v2384_v60 = vld [vmem:[%s4432_s0] sm:$0xff] }
 0x31a   :  { %v874_v4 = vadd.f32 %v2225_v24, %v873_v39  ;;  %v2096_v24 = vpack.c.bf16 %v2021_v34, %v2019_v51  ;;  %v2378_v39 = vld [vmem:[%s4434_s1 + $0x20] sm:$0xff] }
 0x31b   :  { %950 = vmatpush1.bf16.msra.mxu0 %v4696_v28  ;;  %v2379_v28 = vld [vmem:[%s4434_s1 + $0x28] sm:$0xff] }
 0x31c   :  { %951 = vmatprep.subr.bf16.mxu0 %v920_v57  ;;  %v875_v7 = vadd.f32 %v2227_v31, %v874_v4  ;;  %v2023_v31 = vld [vmem:[%s4432_s0 + $0xc0] sm:$0xff]  ;;  %v2030_v57 = vld [vmem:[%s4432_s0 + $0xf8] sm:$0xff]  ;;  %v2380_v4 = vld [vmem:[%s4434_s1 + $0x30] sm:$0xff] }
 0x31e   :  { %v876_v63 = vadd.f32 %v2229_v42, %v875_v7  ;;  %v2100_v42 = vpack.c.bf16 %v2025_v62, %v2023_v31  ;;  %v2381_v7 = vld [vmem:[%s4434_s1 + $0x38] sm:$0xff]  ;;  %v2386_v31 = vld [vmem:[%s4432_s0 + $0x10] sm:$0xff] }
 0x31f   :  { %952 = vmatpush1.bf16.msra.mxu0 %v4697_v23  ;;  %v2382_v23 = vld [vmem:[%s4434_s1 + $0x40] sm:$0xff] }
 0x320   :  { %953 = vmatprep.subr.bf16.mxu0 %v922_v19  ;;  %v877_v29 = vadd.f32 %v2231_v41, %v876_v63  ;;  %v2102_v41 = vpack.c.bf16 %v2030_v57, %v2028_v46  ;;  %v4707_v19 = vld [vmem:[#allocation12_spill] sm:$0xff]  ;;  %v2387_v46 = vld [vmem:[%s4432_s0 + $0x18] sm:$0xff] }
 0x321   :  { %v2383_v63 = vld [vmem:[%s4434_s1 + $0x48] sm:$0xff] }
 0x322   :  { %v878_v0 = vadd.f32 %v2233_v61, %v877_v29  ;;  %v4708_v61 = vld [vmem:[#allocation11_spill] sm:$0xff]  ;;  %v844_v29 = vrot.slane %v3292_v47, 4 }
 0x323   :  { %954 = vmatpush1.bf16.msra.mxu0 %v4698_v1  ;;  %v4709_v54 = vpack.c.bf16 %v4707_v19, %v4708_v61  ;;  %v2388_v61 = vld [vmem:[%s4432_s0 + $0x20] sm:$0xff] }
 0x324   :  { %955 = vmatprep.subr.bf16.mxu0 %v924_v26  ;;  %v879_v48 = vadd.f32 %v2235_v52, %v878_v0  ;;  %v4710_v52 = vld [vmem:[#allocation20_spill] sm:$0xff]  ;;  %v845_v0 = vadd.f32 %v844_v29, %v3292_v47 }
 0x325   :  { %v4712_v26 = vpack.c.bf16 %v4710_v52, %v4711_v2 }
 0x326   :  { %v3324_v5 = vadd.f32 %v2237_v37, %v879_v48  ;;  %v2104_v37 = vpack.c.bf16 %v2029_v40, %v2027_v30  ;;  %v846_v15 = vrot.slane %v845_v0, 2 }
 0x327   :  { %956 = vmatpush1.bf16.msra.mxu0 %v4699_v8 }
 0x328   :  { %957 = vmatprep.subr.bf16.mxu0 %v926_v45  ;;  %v4714_v45 = vld [vmem:[#allocation17_spill] sm:$0xff]  ;;  %v881_v1 = vrot.slane %v3324_v5, 4  ;;  %v847_v8 = vadd.f32 %v846_v15, %v845_v0 }
 0x329   :  { %v4715_v16 = vpack.c.bf16 %v4713_v9, %v4714_v45  ;;  %v2390_v45 = vld [vmem:[%s4432_s0 + $0x30] sm:$0xff] }
 0x32a   :  { %v882_v13 = vadd.f32 %v881_v1, %v3324_v5  ;;  %v848_v38 = vrot.slane %v847_v8, 1 }
 0x32b   :  { %958 = vmatpush1.bf16.msra.mxu0 %v4700_v58 }
 0x32c   :  { %2091 = vmatprep.subr.bf16.mxu0 %v2090_v35  ;;  %v883_v48 = vrot.slane %v882_v13, 2  ;;  %v849_v49 = vadd.f32 %v848_v38, %v847_v8  ;;  %v2396_v8 = vld [vmem:[%s4432_s0 + $0x60] sm:$0xff] }
 0x32e   :  { %960 = vmatmul.mubr.bf16.vlgmr.msra.gmra.mrb[20].mxu0 %v4703_v36  ;;  %v884_v35 = vadd.f32 %v883_v48, %v882_v13  ;;  %2238 = vrcp.f32 %v849_v49  ;;  %v2397_v49 = vld [vmem:[%s4432_s0 + $0x68] sm:$0xff] }
 0x32f   :  { %969 = vmatprep.mubr.bf16.mxu0 %v4706_v18  ;;  %2093 = vmatpush1.bf16.msra.mxu0 %v2092_v6  ;;  %v3449_v6 = vstv %s4435_s3  ;;  %v2385_v18 = vld [vmem:[%s4432_s0 + $0x8] sm:$0xff] }
 0x330   :  { %2095 = vmatprep.subr.bf16.mxu0 %v2094_v12  ;;  %v885_v3 = vrot.slane %v884_v35, 1  ;;  %4723 = vst [vmem:[#allocation28_spill] sm:$0xff] %v3449_v6 }
 0x332   :  { %v886_v56 = vadd.f32 %v885_v3, %v884_v35 }
 0x333   :  { %2097 = vmatpush1.bf16.msra.mxu0 %v2096_v24 }
 0x334   :  { %2099 = vmatprep.subr.bf16.mxu0 %v2098_v55  ;;  %2240 = vrcp.f32 %v886_v56 }
 0x336   :  { %970 = vmatmul.mubr.bf16.gmra.mrb[24].mxu0 %v4709_v54 }
 0x337   :  { %979 = vmatprep.mubr.bf16.mxu0 %v4712_v26  ;;  %2101 = vmatpush1.bf16.msra.mxu0 %v2100_v42  ;;  %v2389_v26 = vld [vmem:[%s4432_s0 + $0x28] sm:$0xff] }
 0x338   :  { %2103 = vmatprep.subr.bf16.mxu0 %v2102_v41  ;;  %v2239_v58 = vpop.eup %2238 }
 0x339   :  { %v3452_v47 = vmul.f32 %v2239_v58, %v3449_v6 }
 0x33b   :  { %2105 = vmatpush1.bf16.msra.mxu0 %v2104_v37 }
 0x33e   :  { %980 = vmatmul.mubr.bf16.gmra.mrb[28].mxu0 %v4715_v16  ;;  %v2241_v12 = vpop.eup %2240 }
 0x33f   :  { %989 = vmatprep.mubr.bf16.mxu0 %v4718_v53  ;;  %v3455_v5 = vmul.f32 %v2241_v12, %v3449_v6  ;;  %v2398_v12 = vld [vmem:[%s4432_s0 + $0x70] sm:$0xff] }
 0x346   :  { %990 = vmatmul.mubr.bf16.gmra.mrb[32].mxu0 %v4721_v43 }
 0x347   :  { %1134 = vmatprep.mubr.f32.mxu0 %v4722_v22 }
 0x34e   :  { %2031 = vmatmul.mubr.msk.f32.vlgmr.msra.gmra.mrb[36].mxu0 %vm106_vm0, %v2374_v17  ;;  %v2392_v17 = vld [vmem:[%s4432_s0 + $0x40] sm:$0xff] }
 0x34f   :  { %1140 = vmatprep.mubr.f32.mxu0 %v4722_v22 }
 0x352   :  { %2032 = vmatmul.mubr.msk.f32.gmra.mrb[38].mxu0 %vm106_vm0, %v2375_v10 }
 0x353   :  { %1146 = vmatprep.mubr.f32.mxu0 %v4722_v22 }
 0x356   :  { %2033 = vmatmul.mubr.msk.f32.gmra.mrb[40].mxu0 %vm106_vm0, %v2376_v14 }
 0x357   :  { %1152 = vmatprep.mubr.f32.mxu0 %v4722_v22 }
 0x35a   :  { %2034 = vmatmul.mubr.msk.f32.gmra.mrb[42].mxu0 %vm106_vm0, %v2377_v27 }
 0x35b   :  { %1158 = vmatprep.mubr.f32.mxu0 %v4722_v22 }
 0x35e   :  { %2035 = vmatmul.mubr.msk.f32.gmra.mrb[44].mxu0 %vm106_vm0, %v2378_v39  ;;  %v2393_v39 = vld [vmem:[%s4432_s0 + $0x48] sm:$0xff] }
 0x35f   :  { %1164 = vmatprep.mubr.f32.mxu0 %v4722_v22 }
 0x362   :  { %2036 = vmatmul.mubr.msk.f32.gmra.mrb[46].mxu0 %vm106_vm0, %v2379_v28 }
 0x363   :  { %1170 = vmatprep.mubr.f32.mxu0 %v4722_v22 }
 0x366   :  { %2037 = vmatmul.mubr.msk.f32.gmra.mrb[48].mxu0 %vm106_vm0, %v2380_v4 }
 0x367   :  { %1176 = vmatprep.mubr.f32.mxu0 %v4722_v22 }
 0x36a   :  { %2038 = vmatmul.mubr.msk.f32.gmra.mrb[50].mxu0 %vm106_vm0, %v2381_v7  ;;  %v2394_v7 = vld [vmem:[%s4432_s0 + $0x50] sm:$0xff] }
 0x36b   :  { %1182 = vmatprep.mubr.f32.mxu0 %v4722_v22 }
 0x36e   :  { %2039 = vmatmul.mubr.msk.f32.gmra.mrb[52].mxu0 %vm106_vm0, %v2382_v23 }
 0x36f   :  { %1188 = vmatprep.mubr.f32.mxu0 %v4722_v22 }
 0x372   :  { %2040 = vmatmul.mubr.msk.f32.gmra.mrb[54].mxu0 %vm106_vm0, %v2383_v63  ;;  %v2395_v63 = vld [vmem:[%s4432_s0 + $0x58] sm:$0xff] }
 0x401   :  { %v961_v51 = vpop.f32.mrb[20].mxu0 }
 0x402   :  { %v1005_v34 = vmul.f32 %v3452_v47, %v961_v51  ;;  %v963_v32 = vpop.f32.mrb[21].mxu0 }
 0x403   :  { %v1006_v25 = vmul.f32 %v3455_v5, %v963_v32  ;;  %v965_v20 = vpop.f32.mrb[22].mxu0  ;;  %v4724_v32 = vld [vmem:[#allocation4_spill] sm:$0xff] }
 0x404   :  { %v1021_v36 = vadd.f32 %v2384_v60, %v1005_v34  ;;  %v1007_v21 = vmul.f32 %v3452_v47, %v965_v20  ;;  %v967_v11 = vpop.f32.mrb[23].mxu0 }
 0x405   :  { %v1022_v24 = vadd.f32 %v2385_v18, %v1006_v25  ;;  %v1008_v55 = vmul.f32 %v3455_v5, %v967_v11 }
 0x406   :  { %1037 = vst [vmem:[%s4436_s4] sm:$0xff] %v1021_v36  ;;  %v1023_v62 = vadd.f32 %v2386_v31, %v1007_v21 }
 0x407   :  { %1038 = vst [vmem:[%s4436_s4 + $0x8] sm:$0xff] %v1022_v24  ;;  %v1024_v57 = vadd.f32 %v2387_v46, %v1008_v55  ;;  %v4725_v24 = vld [vmem:[#allocation3_spill] sm:$0xff] }
 0x408   :  { %1039 = vst [vmem:[%s4436_s4 + $0x10] sm:$0xff] %v1023_v62 }
 0x409   :  { %1040 = vst [vmem:[%s4436_s4 + $0x18] sm:$0xff] %v1024_v57  ;;  %v971_v42 = vpop.f32.mrb[24].mxu0 }
 0x40a   :  { %v1009_v41 = vmul.f32 %v3452_v47, %v971_v42  ;;  %v973_v30 = vpop.f32.mrb[25].mxu0 }
 0x40b   :  { %v1010_v40 = vmul.f32 %v3455_v5, %v973_v30  ;;  %v975_v19 = vpop.f32.mrb[26].mxu0 }
 0x40c   :  { %v1025_v54 = vadd.f32 %v2388_v61, %v1009_v41  ;;  %v1011_v52 = vmul.f32 %v3452_v47, %v975_v19  ;;  %v977_v2 = vpop.f32.mrb[27].mxu0  ;;  %v4728_v61 = vld [vmem:[#allocation6_spill] sm:$0xff] }
 0x40d   :  { %v1026_v37 = vadd.f32 %v2389_v26, %v1010_v40  ;;  %v1012_v9 = vmul.f32 %v3455_v5, %v977_v2  ;;  %v4726_v40 = vld [vmem:[#allocation5_spill] sm:$0xff] }
 0x40e   :  { %1041 = vst [vmem:[%s4436_s4 + $0x20] sm:$0xff] %v1025_v54  ;;  %v1027_v16 = vadd.f32 %v2390_v45, %v1011_v52 }
 0x40f   :  { %1042 = vst [vmem:[%s4436_s4 + $0x28] sm:$0xff] %v1026_v37  ;;  %v1028_v50 = vadd.f32 %v2391_v44, %v1012_v9 }
 0x410   :  { %1043 = vst [vmem:[%s4436_s4 + $0x30] sm:$0xff] %v1027_v16 }
 0x411   :  { %1044 = vst [vmem:[%s4436_s4 + $0x38] sm:$0xff] %v1028_v50  ;;  %v981_v53 = vpop.f32.mrb[28].mxu0  ;;  %v4730_v50 = vld [vmem:[#allocation7_spill] sm:$0xff] }
 0x412   :  { %v1013_v59 = vmul.f32 %v3452_v47, %v981_v53  ;;  %v983_v33 = vpop.f32.mrb[29].mxu0 }
 0x413   :  { %v1014_v43 = vmul.f32 %v3455_v5, %v983_v33  ;;  %v985_v22 = vpop.f32.mrb[30].mxu0 }
 0x414   :  { %v1029_v10 = vadd.f32 %v2392_v17, %v1013_v59  ;;  %v1015_v14 = vmul.f32 %v3452_v47, %v985_v22  ;;  %v987_v27 = vpop.f32.mrb[31].mxu0  ;;  %v4732_v59 = vld [vmem:[#allocation10_spill] sm:$0xff] }
 0x415   :  { %v1030_v28 = vadd.f32 %v2393_v39, %v1014_v43  ;;  %v1016_v4 = vmul.f32 %v3455_v5, %v987_v27 }
 0x416   :  { %1045 = vst [vmem:[%s4436_s4 + $0x40] sm:$0xff] %v1029_v10  ;;  %v1031_v23 = vadd.f32 %v2394_v7, %v1015_v14 }
 0x417   :  { %1046 = vst [vmem:[%s4436_s4 + $0x48] sm:$0xff] %v1030_v28  ;;  %v1032_v29 = vadd.f32 %v2395_v63, %v1016_v4  ;;  %v4736_v4 = vld [vmem:[#allocation13_spill] sm:$0xff] }
 0x418   :  { %1047 = vst [vmem:[%s4436_s4 + $0x50] sm:$0xff] %v1031_v23  ;;  %v4738_v23 = vld [vmem:[#allocation16_spill] sm:$0xff] }
 0x419   :  { %1048 = vst [vmem:[%s4436_s4 + $0x58] sm:$0xff] %v1032_v29  ;;  %v991_v1 = vpop.f32.mrb[32].mxu0 }
 0x41a   :  { %v1017_v0 = vmul.f32 %v3452_v47, %v991_v1  ;;  %v993_v13 = vpop.f32.mrb[33].mxu0 }
 0x41b   :  { %v1018_v15 = vmul.f32 %v3455_v5, %v993_v13  ;;  %v995_v48 = vpop.f32.mrb[34].mxu0 }
 0x41c   :  { %v1033_v35 = vadd.f32 %v2396_v8, %v1017_v0  ;;  %v1019_v38 = vmul.f32 %v3452_v47, %v995_v48  ;;  %v997_v3 = vpop.f32.mrb[35].mxu0  ;;  %v2399_v47 = vld [vmem:[%s4432_s0 + $0x78] sm:$0xff] }
 0x41d   :  { %v1034_v56 = vadd.f32 %v2397_v49, %v1018_v15  ;;  %v1020_v58 = vmul.f32 %v3455_v5, %v997_v3  ;;  %v4744_v49 = vld [vmem:[#allocation22_spill] sm:$0xff] }
 0x41e   :  { %1049 = vst [vmem:[%s4436_s4 + $0x60] sm:$0xff] %v1033_v35  ;;  %v1035_v51 = vadd.f32 %v2398_v12, %v1019_v38  ;;  %v4742_v38 = vld [vmem:[#allocation21_spill] sm:$0xff] }
 0x41f   :  { %1050 = vst [vmem:[%s4436_s4 + $0x68] sm:$0xff] %v1034_v56  ;;  %v1036_v34 = vadd.f32 %v2399_v47, %v1020_v58 }
 0x420   :  { %1051 = vst [vmem:[%s4436_s4 + $0x70] sm:$0xff] %v1035_v51 }
 0x421   :  { %1052 = vst [vmem:[%s4436_s4 + $0x78] sm:$0xff] %v1036_v34  ;;  %v1136_v5 = vpop.f32.mrb[36].mxu0 }
 0x422   :  { %v1137_v25 = vadd.f32 %v1136_v5, %v4724_v32  ;;  %v1138_v20 = vpop.f32.mrb[37].mxu0 }
 0x423   :  { %v1139_v60 = vadd.f32 %v1138_v20, %v4724_v32  ;;  %v4748_v32 = vmov 0  }
 0x424   :  { %v1197_v36 = vpack.c.bf16 %v1137_v25, %v1137_v25 }
 0x425   :  { %v1198_v21 = vpack.c.bf16 %v1139_v60, %v1139_v60  ;;  %v1142_v11 = vpop.f32.mrb[38].mxu0 }
 0x426   :  { %v1280_v18 = vsel %vm347_vm1, %v1197_v36, 0  ;;  %v1143_v55 = vadd.f32 %v1142_v11, %v4725_v24  ;;  %v1144_v31 = vpop.f32.mrb[39].mxu0 }
 0x427   :  { %v1145_v62 = vadd.f32 %v1144_v31, %v4725_v24  ;;  %2041 = vmatprep.subr.msk.bf16.mxu1 %vm347_vm1, %v1198_v21 }
 0x428   :  { %v1195_v46 = vpack.c.bf16 %v1143_v55, %v1143_v55  ;;  %1286 = vmatpush1.bf16.msra.mxu1 %v1280_v18 }
 0x429   :  { %v1196_v57 = vpack.c.bf16 %v1145_v62, %v1145_v62  ;;  %v1148_v42 = vpop.f32.mrb[40].mxu0 }
 0x42a   :  { %v1150_v41 = vpop.f32.mrb[41].mxu0  ;;  %1199 = vxpose.xlu0.c.b16.start.end [1/1] (short) %v1195_v46, 128  ;;  %v3576_v19 = vadd.f32 %v1148_v42, %v4726_v40 }
 0x42b   :  { %1215 = vxpose.xlu1.c.b16.start.end [1/1] (short) %v1196_v57, 128  ;;  %v1151_v2 = vadd.f32 %v1150_v41, %v4726_v40 }
 0x42c   :  { %4727 = vst [vmem:[#allocation29_spill] sm:$0xff] %v3576_v19 }
 0x42d   :  { %v1154_v30 = vpop.f32.mrb[42].mxu0 }
 0x42e   :  { %v3579_v54 = vadd.f32 %v1154_v30, %v4728_v61  ;;  %v1156_v52 = vpop.f32.mrb[43].mxu0 }
 0x42f   :  { %v1157_v26 = vadd.f32 %v1156_v52, %v4728_v61 }
 0x430   :  { %4729 = vst [vmem:[#allocation30_spill] sm:$0xff] %v3579_v54 }
 0x431   :  { %v1819_v9 = vpack.c.bf16 %v1157_v26, %v1151_v2  ;;  %v1160_v45 = vpop.f32.mrb[44].mxu0 }
 0x432   :  { %v1162_v16 = vpop.f32.mrb[45].mxu0  ;;  %v3586_v53 = vadd.f32 %v1160_v45, %v4730_v50 }
 0x433   :  { %1890 = vmatprep.mubr.bf16.mxu0 %v1819_v9  ;;  %v3592_v22 = vadd.f32 %v1162_v16, %v4730_v50 }
 0x434   :  { %4731 = vst [vmem:[#allocation31_spill] sm:$0xff] %v3586_v53 }
 0x435   :  { %v1166_v44 = vpop.f32.mrb[46].mxu0  ;;  %4734 = vst [vmem:[#allocation33_spill] sm:$0xff] %v3592_v22 }
 0x436   :  { %v3589_v33 = vadd.f32 %v1166_v44, %v4732_v59  ;;  %v1168_v43 = vpop.f32.mrb[47].mxu0 }
 0x437   :  { %v3595_v17 = vadd.f32 %v1168_v43, %v4732_v59 }
 0x438   :  { %4733 = vst [vmem:[#allocation32_spill] sm:$0xff] %v3589_v33 }
 0x439   :  { %4735 = vst [vmem:[#allocation34_spill] sm:$0xff] %v3595_v17  ;;  %v1172_v27 = vpop.f32.mrb[48].mxu0 }
 0x43a   :  { %v1174_v39 = vpop.f32.mrb[49].mxu0  ;;  %v3602_v7 = vadd.f32 %v1172_v27, %v4736_v4 }
 0x43b   :  { %v3608_v1 = vadd.f32 %v1174_v39, %v4736_v4 }
 0x43c   :  { %4737 = vst [vmem:[#allocation35_spill] sm:$0xff] %v3602_v7 }
 0x43d   :  { %v1178_v28 = vpop.f32.mrb[50].mxu0  ;;  %4740 = vst [vmem:[#allocation37_spill] sm:$0xff] %v3608_v1 }
 0x43e   :  { %v3605_v63 = vadd.f32 %v1178_v28, %v4738_v23  ;;  %v1180_v29 = vpop.f32.mrb[51].mxu0 }
 0x43f   :  { %v3611_v0 = vadd.f32 %v1180_v29, %v4738_v23 }
 0x440   :  { %4739 = vst [vmem:[#allocation36_spill] sm:$0xff] %v3605_v63 }
 0x441   :  { %4741 = vst [vmem:[#allocation38_spill] sm:$0xff] %v3611_v0  ;;  %v1184_v48 = vpop.f32.mrb[52].mxu0 }
 0x442   :  { %v1186_v8 = vpop.f32.mrb[53].mxu0  ;;  %v3618_v3 = vadd.f32 %v1184_v48, %v4742_v38 }
 0x443   :  { %v3624_v12 = vadd.f32 %v1186_v8, %v4742_v38 }
 0x444   :  { %4743 = vst [vmem:[#allocation39_spill] sm:$0xff] %v3618_v3 }
 0x445   :  { %v1190_v35 = vpop.f32.mrb[54].mxu0  ;;  %4746 = vst [vmem:[#allocation41_spill] sm:$0xff] %v3624_v12 }
 0x446   :  { %v3621_v56 = vadd.f32 %v1190_v35, %v4744_v49  ;;  %v1192_v58 = vpop.f32.mrb[55].mxu0 }
 0x447   :  { %v3627_v51 = vadd.f32 %v1192_v58, %v4744_v49 }
 0x448   :  { %4745 = vst [vmem:[#allocation40_spill] sm:$0xff] %v3621_v56 }
 0x449   :  { %4747 = vst [vmem:[#allocation43_spill] sm:$0xff] %v3627_v51 }
 0x490   :  { %v1207_v5 = vpop.trf.xlu0 }
 0x491   :  { %2042 = vmatmul.mubr.msk.bf16.vlgmr.msra.gmra.mrb[64].mxu1 %vm298_vm2, %v1207_v5  ;;  %v1223_v24 = vpop.trf.xlu1 }
 0x492   :  { %1327 = vmatprep.mubr.bf16.mxu1 %v4748_v32 }
 0x494   :  { %v1208_v25 = vpop.trf.xlu0 }
 0x495   :  { %v1224_v55 = vpop.trf.xlu1 }
 0x498   :  { %v1209_v20 = vpop.trf.xlu0 }
 0x499   :  { %2043 = vmatmul.mubr.msk.bf16.gmra.mrb[68].mxu1 %vm298_vm2, %v1208_v25  ;;  %v1225_v31 = vpop.trf.xlu1 }
 0x49a   :  { %1337 = vmatprep.mubr.bf16.mxu1 %v4748_v32 }
 0x49c   :  { %v1210_v60 = vpop.trf.xlu0 }
 0x49d   :  { %v1226_v62 = vpop.trf.xlu1 }
 0x4a0   :  { %v1211_v36 = vpop.trf.xlu0 }
 0x4a1   :  { %2044 = vmatmul.mubr.msk.bf16.gmra.mrb[72].mxu1 %vm298_vm2, %v1209_v20  ;;  %v1227_v46 = vpop.trf.xlu1 }
 0x4a2   :  { %1347 = vmatprep.mubr.bf16.mxu1 %v4748_v32 }
 0x4a4   :  { %v1212_v21 = vpop.trf.xlu0 }
 0x4a5   :  { %v1228_v57 = vpop.trf.xlu1 }
 0x4a8   :  { %v1213_v11 = vpop.trf.xlu0 }
 0x4a9   :  { %2045 = vmatmul.mubr.msk.bf16.gmra.mrb[76].mxu1 %vm298_vm2, %v1210_v60  ;;  %v1229_v42 = vpop.trf.xlu1 }
 0x4aa   :  { %1357 = vmatprep.mubr.bf16.mxu1 %v4748_v32 }
 0x4ac   :  { %v1214_v18 = vpop.trf.xlu0 }
 0x4ad   :  { %v1230_v41 = vpop.trf.xlu1 }
 0x4b1   :  { %2046 = vmatmul.mubr.msk.bf16.gmra.mrb[80].mxu1 %vm298_vm2, %v1211_v36 }
 0x4b2   :  { %1367 = vmatprep.mubr.bf16.mxu1 %v4748_v32 }
 0x4b9   :  { %2047 = vmatmul.mubr.msk.bf16.gmra.mrb[84].mxu1 %vm298_vm2, %v1212_v21 }
 0x4ba   :  { %1377 = vmatprep.mubr.bf16.mxu1 %v4748_v32 }
 0x4c1   :  { %2048 = vmatmul.mubr.msk.bf16.gmra.mrb[88].mxu1 %vm298_vm2, %v1213_v11 }
 0x4c2   :  { %1387 = vmatprep.mubr.bf16.mxu1 %v4748_v32 }
 0x4c9   :  { %2049 = vmatmul.mubr.msk.bf16.gmra.mrb[92].mxu1 %vm298_vm2, %v1214_v18 }
 0x4ca   :  { %1397 = vmatprep.mubr.bf16.mxu1 %v4748_v32 }
 0x4d1   :  { %2050 = vmatmul.mubr.msk.bf16.gmra.mrb[96].mxu1 %vm298_vm2, %v1223_v24 }
 0x4d2   :  { %1407 = vmatprep.mubr.bf16.mxu1 %v4748_v32 }
 0x4d9   :  { %2051 = vmatmul.mubr.msk.bf16.gmra.mrb[100].mxu1 %vm298_vm2, %v1224_v55 }
 0x4da   :  { %1417 = vmatprep.mubr.bf16.mxu1 %v4748_v32 }
 0x4e1   :  { %2052 = vmatmul.mubr.msk.bf16.gmra.mrb[104].mxu1 %vm298_vm2, %v1225_v31 }
 0x4e2   :  { %1427 = vmatprep.mubr.bf16.mxu1 %v4748_v32 }
 0x4e9   :  { %2053 = vmatmul.mubr.msk.bf16.gmra.mrb[108].mxu1 %vm298_vm2, %v1226_v62 }
 0x4ea   :  { %1437 = vmatprep.mubr.bf16.mxu1 %v4748_v32 }
 0x4f1   :  { %2054 = vmatmul.mubr.msk.bf16.gmra.mrb[112].mxu1 %vm298_vm2, %v1227_v46 }
 0x4f2   :  { %1447 = vmatprep.mubr.bf16.mxu1 %v4748_v32 }
 0x4f9   :  { %2055 = vmatmul.mubr.msk.bf16.gmra.mrb[116].mxu1 %vm298_vm2, %v1228_v57 }
 0x4fa   :  { %1457 = vmatprep.mubr.bf16.mxu1 %v4748_v32 }
 0x501   :  { %2056 = vmatmul.mubr.msk.bf16.gmra.mrb[120].mxu1 %vm298_vm2, %v1229_v42 }
 0x502   :  { %1467 = vmatprep.mubr.bf16.mxu1 %v4748_v32 }
 0x509   :  { %2057 = vmatmul.mubr.msk.bf16.gmra.mrb[124].mxu1 %vm298_vm2, %v1230_v41 }
 0x564   :  { %v3664_v30 = vpop.f32.mrb[64].mxu1 }
 0x565   :  { %v3666_v40 = vpop.f32.mrb[65].mxu1 }
 0x566   :  { %v3668_v61 = vpop.f32.mrb[66].mxu1 }
 0x567   :  { %v3670_v52 = vpop.f32.mrb[67].mxu1 }
 0x56c   :  { %v3672_v2 = vpop.f32.mrb[68].mxu1 }
 0x56d   :  { %v1478_v26 = vmax.f32 %v3664_v30, %v3672_v2  ;;  %v3676_v9 = vpop.f32.mrb[69].mxu1 }
 0x56e   :  { %v1515_v45 = vmax.f32 %v3666_v40, %v3676_v9  ;;  %v3680_v16 = vpop.f32.mrb[70].mxu1 }
 0x56f   :  { %v1479_v44 = vmax.f32 %v3668_v61, %v3680_v16  ;;  %v3684_v50 = vpop.f32.mrb[71].mxu1 }
 0x570   :  { %v1516_v59 = vmax.f32 %v3670_v52, %v3684_v50 }
 0x574   :  { %v3688_v43 = vpop.f32.mrb[72].mxu1 }
 0x575   :  { %v1480_v27 = vmax.f32 %v1478_v26, %v3688_v43  ;;  %v3691_v39 = vpop.f32.mrb[73].mxu1 }
 0x576   :  { %v1517_v28 = vmax.f32 %v1515_v45, %v3691_v39  ;;  %v3694_v4 = vpop.f32.mrb[74].mxu1 }
 0x577   :  { %v1481_v23 = vmax.f32 %v1479_v44, %v3694_v4  ;;  %v3697_v29 = vpop.f32.mrb[75].mxu1 }
 0x578   :  { %v1518_v48 = vmax.f32 %v1516_v59, %v3697_v29 }
 0x57c   :  { %v3700_v8 = vpop.f32.mrb[76].mxu1 }
 0x57d   :  { %v1482_v35 = vmax.f32 %v1480_v27, %v3700_v8  ;;  %v3703_v38 = vpop.f32.mrb[77].mxu1 }
 0x57e   :  { %v1519_v49 = vmax.f32 %v1517_v28, %v3703_v38  ;;  %v3706_v58 = vpop.f32.mrb[78].mxu1 }
 0x57f   :  { %v1483_v5 = vmax.f32 %v1481_v23, %v3706_v58  ;;  %v3709_v32 = vpop.f32.mrb[79].mxu1 }
 0x580   :  { %v1520_v25 = vmax.f32 %v1518_v48, %v3709_v32 }
 0x584   :  { %v3712_v20 = vpop.f32.mrb[80].mxu1 }
 0x585   :  { %v1484_v60 = vmax.f32 %v1482_v35, %v3712_v20  ;;  %v3715_v36 = vpop.f32.mrb[81].mxu1 }
 0x586   :  { %v1521_v21 = vmax.f32 %v1519_v49, %v3715_v36  ;;  %v3718_v11 = vpop.f32.mrb[82].mxu1 }
 0x587   :  { %v1485_v18 = vmax.f32 %v1483_v5, %v3718_v11  ;;  %v3721_v24 = vpop.f32.mrb[83].mxu1 }
 0x588   :  { %v1522_v55 = vmax.f32 %v1520_v25, %v3721_v24 }
 0x58c   :  { %v3724_v31 = vpop.f32.mrb[84].mxu1 }
 0x58d   :  { %v1486_v62 = vmax.f32 %v1484_v60, %v3724_v31  ;;  %v3727_v46 = vpop.f32.mrb[85].mxu1 }
 0x58e   :  { %v1523_v57 = vmax.f32 %v1521_v21, %v3727_v46  ;;  %v3730_v42 = vpop.f32.mrb[86].mxu1 }
 0x58f   :  { %v1487_v41 = vmax.f32 %v1485_v18, %v3730_v42  ;;  %v3733_v26 = vpop.f32.mrb[87].mxu1 }
 0x590   :  { %4749 = vst [vmem:[#allocation45_spill] sm:$0xff] %v3733_v26  ;;  %v1524_v45 = vmax.f32 %v1522_v55, %v3733_v26 }
 0x594   :  { %v3736_v44 = vpop.f32.mrb[88].mxu1 }
 0x595   :  { %v1488_v59 = vmax.f32 %v1486_v62, %v3736_v44  ;;  %v3739_v27 = vpop.f32.mrb[89].mxu1 }
 0x596   :  { %4750 = vst [vmem:[#allocation46_spill] sm:$0xff] %v3739_v27  ;;  %v1525_v28 = vmax.f32 %v1523_v57, %v3739_v27  ;;  %v3742_v23 = vpop.f32.mrb[90].mxu1 }
 0x597   :  { %v1489_v48 = vmax.f32 %v1487_v41, %v3742_v23  ;;  %v3745_v35 = vpop.f32.mrb[91].mxu1 }
 0x598   :  { %4751 = vst [vmem:[#allocation42_spill] sm:$0xff] %v3745_v35  ;;  %v1526_v49 = vmax.f32 %v1524_v45, %v3745_v35 }
 0x59c   :  { %v3748_v5 = vpop.f32.mrb[92].mxu1 }
 0x59d   :  { %v1490_v25 = vmax.f32 %v1488_v59, %v3748_v5  ;;  %v3751_v60 = vpop.f32.mrb[93].mxu1 }
 0x59e   :  { %4752 = vst [vmem:[#allocation44_spill] sm:$0xff] %v3751_v60  ;;  %v1527_v21 = vmax.f32 %v1525_v28, %v3751_v60  ;;  %v3754_v18 = vpop.f32.mrb[94].mxu1 }
 0x59f   :  { %v1491_v55 = vmax.f32 %v1489_v48, %v3754_v18  ;;  %v3757_v62 = vpop.f32.mrb[95].mxu1 }
 0x5a0   :  { %4753 = vst [vmem:[#allocation47_spill] sm:$0xff] %v3757_v62  ;;  %v1528_v57 = vmax.f32 %v1526_v49, %v3757_v62 }
 0x5a4   :  { %v3760_v41 = vpop.f32.mrb[96].mxu1 }
 0x5a5   :  { %v1492_v45 = vmax.f32 %v1490_v25, %v3760_v41  ;;  %v3763_v47 = vpop.f32.mrb[97].mxu1 }
 0x5a6   :  { %4754 = vst [vmem:[#allocation27_spill] sm:$0xff] %v3763_v47  ;;  %v1529_v59 = vmax.f32 %v1527_v21, %v3763_v47  ;;  %v3766_v34 = vpop.f32.mrb[98].mxu1 }
 0x5a7   :  { %v1493_v28 = vmax.f32 %v1491_v55, %v3766_v34  ;;  %v3769_v13 = vpop.f32.mrb[99].mxu1 }
 0x5a8   :  { %4755 = vst [vmem:[#allocation9_spill] sm:$0xff] %v3769_v13  ;;  %v1530_v48 = vmax.f32 %v1528_v57, %v3769_v13 }
 0x5ac   :  { %v3772_v15 = vpop.f32.mrb[100].mxu1 }
 0x5ad   :  { %v1494_v49 = vmax.f32 %v1492_v45, %v3772_v15  ;;  %v3775_v10 = vpop.f32.mrb[101].mxu1 }
 0x5ae   :  { %4756 = vst [vmem:[#allocation8_spill] sm:$0xff] %v3775_v10  ;;  %v1531_v25 = vmax.f32 %v1529_v59, %v3775_v10  ;;  %v3778_v14 = vpop.f32.mrb[102].mxu1 }
 0x5af   :  { %v1495_v21 = vmax.f32 %v1493_v28, %v3778_v14  ;;  %v3781_v37 = vpop.f32.mrb[103].mxu1 }
 0x5b0   :  { %4757 = vst [vmem:[#allocation15_spill] sm:$0xff] %v3781_v37  ;;  %v1532_v55 = vmax.f32 %v1530_v48, %v3781_v37 }
 0x5b4   :  { %v3784_v6 = vpop.f32.mrb[104].mxu1 }
 0x5b5   :  { %v1496_v57 = vmax.f32 %v1494_v49, %v3784_v6  ;;  %v3787_v3 = vpop.f32.mrb[105].mxu1 }
 0x5b6   :  { %4758 = vst [vmem:[#allocation14_spill] sm:$0xff] %v3787_v3  ;;  %v1533_v45 = vmax.f32 %v1531_v25, %v3787_v3  ;;  %v3790_v56 = vpop.f32.mrb[106].mxu1 }
 0x5b7   :  { %v1497_v59 = vmax.f32 %v1495_v21, %v3790_v56  ;;  %v3793_v12 = vpop.f32.mrb[107].mxu1 }
 0x5b8   :  { %4759 = vst [vmem:[#allocation12_spill] sm:$0xff] %v3793_v12  ;;  %v1534_v28 = vmax.f32 %v1532_v55, %v3793_v12 }
 0x5bc   :  { %v3796_v51 = vpop.f32.mrb[108].mxu1 }
 0x5bd   :  { %v1498_v48 = vmax.f32 %v1496_v57, %v3796_v51  ;;  %v3799_v7 = vpop.f32.mrb[109].mxu1 }
 0x5be   :  { %4760 = vst [vmem:[#allocation11_spill] sm:$0xff] %v3799_v7  ;;  %v1535_v49 = vmax.f32 %v1533_v45, %v3799_v7  ;;  %v3802_v63 = vpop.f32.mrb[110].mxu1 }
 0x5bf   :  { %v1499_v25 = vmax.f32 %v1497_v59, %v3802_v63  ;;  %v3805_v1 = vpop.f32.mrb[111].mxu1 }
 0x5c0   :  { %4761 = vst [vmem:[#allocation20_spill] sm:$0xff] %v3805_v1  ;;  %v1536_v21 = vmax.f32 %v1534_v28, %v3805_v1 }
 0x5c4   :  { %v3808_v0 = vpop.f32.mrb[112].mxu1 }
 0x5c5   :  { %v1500_v55 = vmax.f32 %v1498_v48, %v3808_v0  ;;  %v3811_v53 = vpop.f32.mrb[113].mxu1 }
 0x5c6   :  { %4762 = vst [vmem:[#allocation19_spill] sm:$0xff] %v3811_v53  ;;  %v1537_v57 = vmax.f32 %v1535_v49, %v3811_v53  ;;  %v3814_v33 = vpop.f32.mrb[114].mxu1 }
 0x5c7   :  { %v1501_v45 = vmax.f32 %v1499_v25, %v3814_v33  ;;  %v3817_v22 = vpop.f32.mrb[115].mxu1 }
 0x5c8   :  { %4763 = vst [vmem:[#allocation18_spill] sm:$0xff] %v3817_v22  ;;  %v1538_v59 = vmax.f32 %v1536_v21, %v3817_v22 }
 0x5cc   :  { %v3820_v17 = vpop.f32.mrb[116].mxu1 }
 0x5cd   :  { %v1502_v28 = vmax.f32 %v1500_v55, %v3820_v17  ;;  %v3823_v19 = vpop.f32.mrb[117].mxu1 }
 0x5ce   :  { %4764 = vst [vmem:[#allocation17_spill] sm:$0xff] %v3823_v19  ;;  %v1539_v48 = vmax.f32 %v1537_v57, %v3823_v19  ;;  %v3826_v54 = vpop.f32.mrb[118].mxu1 }
 0x5cf   :  { %v1503_v49 = vmax.f32 %v1501_v45, %v3826_v54  ;;  %v3829_v53 = vpop.f32.mrb[119].mxu1 }
 0x5d0   :  { %4765 = vst [vmem:[#allocation26_spill] sm:$0xff] %v3829_v53  ;;  %v1540_v25 = vmax.f32 %v1538_v59, %v3829_v53 }
 0x5d4   :  { %v3832_v1 = vpop.f32.mrb[120].mxu1 }
 0x5d5   :  { %v1504_v21 = vmax.f32 %v1502_v28, %v3832_v1  ;;  %v3835_v22 = vpop.f32.mrb[121].mxu1 }
 0x5d6   :  { %4766 = vst [vmem:[#allocation24_spill] sm:$0xff] %v3835_v22  ;;  %v1541_v55 = vmax.f32 %v1539_v48, %v3835_v22  ;;  %v3838_v7 = vpop.f32.mrb[122].mxu1 }
 0x5d7   :  { %v1505_v57 = vmax.f32 %v1503_v49, %v3838_v7  ;;  %v3841_v19 = vpop.f32.mrb[123].mxu1 }
 0x5d8   :  { %4767 = vst [vmem:[#allocation25_spill] sm:$0xff] %v3841_v19  ;;  %v1542_v45 = vmax.f32 %v1540_v25, %v3841_v19 }
 0x5dc   :  { %v3844_v12 = vpop.f32.mrb[124].mxu1 }
 0x5dd   :  { %v1506_v59 = vmax.f32 %v1504_v21, %v3844_v12  ;;  %v3847_v53 = vpop.f32.mrb[125].mxu1 }
 0x5de   :  { %4768 = vst [vmem:[#allocation23_spill] sm:$0xff] %v3847_v53  ;;  %v1543_v28 = vmax.f32 %v1541_v55, %v3847_v53  ;;  %v3850_v3 = vpop.f32.mrb[126].mxu1 }
 0x5df   :  { %v1507_v48 = vmax.f32 %v1505_v57, %v3850_v3  ;;  %v3853_v22 = vpop.f32.mrb[127].mxu1 }
 0x5e0   :  { %4769 = vst [vmem:[#allocation4_spill] sm:$0xff] %v3853_v22  ;;  %v1544_v49 = vmax.f32 %v1542_v45, %v3853_v22 }
 0x5e1   :  { %v1508_v37 = vmax.f32 %v1506_v59, %v1507_v48 }
 0x5e2   :  { %v1545_v10 = vmax.f32 %v1543_v28, %v1544_v49 }
 0x5e3   :  { %v1509_v13 = vrot.slane %v1508_v37, 4 }
 0x5e4   :  { %v1546_v25 = vrot.slane %v1545_v10, 4 }
 0x5e5   :  { %v1510_v19 = vmax.f32 %v1508_v37, %v1509_v13 }
 0x5e6   :  { %v1547_v47 = vmax.f32 %v1545_v10, %v1546_v25 }
 0x5e7   :  { %v1511_v62 = vrot.slane %v1510_v19, 2 }
 0x5e8   :  { %v1548_v21 = vrot.slane %v1547_v47, 2 }
 0x5e9   :  { %v1512_v60 = vmax.f32 %v1510_v19, %v1511_v62 }
 0x5ea   :  { %v1549_v35 = vmax.f32 %v1547_v47, %v1548_v21 }
 0x5eb   :  { %v1513_v27 = vrot.slane %v1512_v60, 1 }
 0x5ec   :  { %v1550_v55 = vrot.slane %v1549_v35, 1 }
 0x5ed   :  { %v3856_v53 = vmax.f32 %v1512_v60, %v1513_v27 }
 0x5ee   :  { %v3858_v26 = vmax.f32 %v1549_v35, %v1550_v55 }
 0x5ef   :  { %v1552_v57 = vsub.f32 %v3664_v30, %v3856_v53  ;;  %v1554_v45 = vsub.f32 %v3668_v61, %v3856_v53  ;;  %v1556_v37 = vsub.f32 %v3672_v2, %v3856_v53  ;;  %v1558_v10 = vsub.f32 %v3680_v16, %v3856_v53 }
 0x5f0   :  { %v1560_v19 = vsub.f32 %v3688_v43, %v3856_v53  ;;  %v1562_v13 = vsub.f32 %v3694_v4, %v3856_v53  ;;  %v1564_v47 = vsub.f32 %v3700_v8, %v3856_v53  ;;  %v1566_v30 = vsub.f32 %v3706_v58, %v3856_v53 }
 0x5f1   :  { %v1568_v61 = vsub.f32 %v3712_v20, %v3856_v53  ;;  %v1570_v2 = vsub.f32 %v3718_v11, %v3856_v53  ;;  %v1572_v16 = vsub.f32 %v3724_v31, %v3856_v53  ;;  %v1574_v43 = vsub.f32 %v3730_v42, %v3856_v53 }
 0x5f2   :  { %v1576_v4 = vsub.f32 %v3736_v44, %v3856_v53  ;;  %v1578_v8 = vsub.f32 %v3742_v23, %v3856_v53  ;;  %v1580_v58 = vsub.f32 %v3748_v5, %v3856_v53  ;;  %v1582_v20 = vsub.f32 %v3754_v18, %v3856_v53 }
 0x5f3   :  { %v1584_v11 = vsub.f32 %v3760_v41, %v3856_v53  ;;  %v1586_v31 = vsub.f32 %v3766_v34, %v3856_v53  ;;  %v1588_v42 = vsub.f32 %v3772_v15, %v3856_v53  ;;  %v1590_v44 = vsub.f32 %v3778_v14, %v3856_v53  ;;  %v4789_v34 = vld [vmem:[#allocation23_spill] sm:$0xff] }
 0x5f4   :  { %v1592_v27 = vsub.f32 %v3784_v6, %v3856_v53  ;;  %v1594_v23 = vsub.f32 %v3790_v56, %v3856_v53  ;;  %v1596_v35 = vsub.f32 %v3796_v51, %v3856_v53  ;;  %v1598_v5 = vsub.f32 %v3802_v63, %v3856_v53 }
 0x5f5   :  { %v1616_v18 = vmul.f32 1.442695, %v1552_v57  ;;  %v1620_v62 = vmul.f32 1.442695, %v1554_v45  ;;  %v1624_v41 = vmul.f32 1.442695, %v1556_v37 }
 0x5f6   :  { %v1628_v28 = vmul.f32 1.442695, %v1558_v10  ;;  %v1632_v49 = vmul.f32 1.442695, %v1560_v19  ;;  %v1636_v25 = vmul.f32 1.442695, %v1562_v13 }
 0x5f7   :  { %2242 = vpow2.f32 %v1616_v18  ;;  %v1640_v21 = vmul.f32 1.442695, %v1564_v47  ;;  %v1644_v55 = vmul.f32 1.442695, %v1566_v30  ;;  %v1648_v63 = vmul.f32 1.442695, %v1568_v61 }
 0x5f8   :  { %2244 = vpow2.f32 %v1620_v62  ;;  %v1652_v60 = vmul.f32 1.442695, %v1570_v2  ;;  %v1656_v57 = vmul.f32 1.442695, %v1572_v16  ;;  %v1660_v45 = vmul.f32 1.442695, %v1574_v43 }
 0x5f9   :  { %2246 = vpow2.f32 %v1624_v41  ;;  %v1664_v37 = vmul.f32 1.442695, %v1576_v4  ;;  %v1668_v59 = vmul.f32 1.442695, %v1578_v8  ;;  %v1672_v10 = vmul.f32 1.442695, %v1580_v58 }
 0x5fa   :  { %2248 = vpow2.f32 %v1628_v28  ;;  %v1676_v51 = vmul.f32 1.442695, %v1582_v20  ;;  %v1680_v48 = vmul.f32 1.442695, %v1584_v11  ;;  %v1684_v18 = vmul.f32 1.442695, %v1586_v31 }
 0x5fb   :  { %2250 = vpow2.f32 %v1632_v49  ;;  %v1688_v19 = vmul.f32 1.442695, %v1588_v42  ;;  %v1692_v13 = vmul.f32 1.442695, %v1590_v44  ;;  %v1696_v62 = vmul.f32 1.442695, %v1592_v27 }
 0x5fc   :  { %2252 = vpow2.f32 %v1636_v25  ;;  %v3928_v47 = vmul.f32 1.442695, %v1594_v23  ;;  %v3930_v30 = vmul.f32 1.442695, %v1596_v35  ;;  %v3932_v61 = vmul.f32 1.442695, %v1598_v5 }
 0x5fd   :  { %2254 = vpow2.f32 %v1640_v21  ;;  %v4770_v27 = vld [vmem:[#allocation45_spill] sm:$0xff]  ;;  %v4772_v41 = vld [vmem:[#allocation42_spill] sm:$0xff]  ;;  %v4773_v25 = vld [vmem:[#allocation44_spill] sm:$0xff] }
 0x5fe   :  { %2256 = vpow2.f32 %v1644_v55  ;;  %v4774_v55 = vld [vmem:[#allocation47_spill] sm:$0xff]  ;;  %v4776_v44 = vld [vmem:[#allocation9_spill] sm:$0xff]  ;;  %v4777_v42 = vld [vmem:[#allocation8_spill] sm:$0xff] }
 0x5ff   :  { %2258 = vpow2.f32 %v1648_v63  ;;  %v4771_v63 = vld [vmem:[#allocation46_spill] sm:$0xff]  ;;  %v4778_v21 = vld [vmem:[#allocation15_spill] sm:$0xff]  ;;  %v4780_v58 = vld [vmem:[#allocation12_spill] sm:$0xff] }
 0x600   :  { %2260 = vpow2.f32 %v1652_v60  ;;  %v4779_v20 = vld [vmem:[#allocation14_spill] sm:$0xff]  ;;  %v4781_v28 = vld [vmem:[#allocation11_spill] sm:$0xff]  ;;  %v4782_v43 = vld [vmem:[#allocation20_spill] sm:$0xff] }
 0x601   :  { %v3942_v8 = vpop.eup %2242  ;;  %2262 = vpow2.f32 %v1656_v57  ;;  %v4783_v57 = vld [vmem:[#allocation19_spill] sm:$0xff]  ;;  %v4784_v2 = vld [vmem:[#allocation18_spill] sm:$0xff] }
 0x602   :  { %v3950_v31 = vpop.eup %2244  ;;  %2264 = vpow2.f32 %v1660_v45  ;;  %v4775_v45 = vld [vmem:[#allocation27_spill] sm:$0xff] }
 0x603   :  { %v3958_v35 = vpop.eup %2246  ;;  %2266 = vpow2.f32 %v1664_v37  ;;  %v1744_v5 = vadd.f32 %v3950_v31, %v3942_v8  ;;  %v4788_v37 = vld [vmem:[#allocation25_spill] sm:$0xff] }
 0x604   :  { %v3966_v49 = vpop.eup %2248  ;;  %2268 = vpow2.f32 %v1668_v59  ;;  %v4786_v59 = vld [vmem:[#allocation26_spill] sm:$0xff] }
 0x605   :  { %v3974_v23 = vpop.eup %2250  ;;  %2270 = vpow2.f32 %v1672_v10  ;;  %v1745_v60 = vadd.f32 %v3958_v35, %v1744_v5 }
 0x606   :  { %v3981_v11 = vpop.eup %2252  ;;  %2272 = vpow2.f32 %v1676_v51 }
 0x607   :  { %v3989_v4 = vpop.eup %2254  ;;  %2274 = vpow2.f32 %v1680_v48  ;;  %v1746_v5 = vadd.f32 %v3966_v49, %v1745_v60 }
 0x608   :  { %v3996_v16 = vpop.eup %2256  ;;  %2276 = vpow2.f32 %v1684_v18 }
 0x609   :  { %v4004_v6 = vpop.eup %2258  ;;  %2278 = vpow2.f32 %v1688_v19  ;;  %v1747_v60 = vadd.f32 %v3974_v23, %v1746_v5  ;;  %v4790_v5 = vsub.f32 %v3808_v0, %v3856_v53 }
 0x60a   :  { %v4011_v15 = vpop.eup %2260  ;;  %2280 = vpow2.f32 %v1692_v13  ;;  %v4791_v13 = vsub.f32 %v3814_v33, %v3856_v53 }
 0x60b   :  { %v4019_v56 = vpop.eup %2262  ;;  %2282 = vpow2.f32 %v1696_v62  ;;  %v1712_v51 = vmul.f32 1.442695, %v4790_v5  ;;  %v1748_v18 = vadd.f32 %v3981_v11, %v1747_v60  ;;  %v4792_v62 = vsub.f32 %v3820_v17, %v3856_v53 }
 0x60c   :  { %v4025_v14 = vpop.eup %2264  ;;  %2284 = vpow2.f32 %v3928_v47  ;;  %v1716_v48 = vmul.f32 1.442695, %v4791_v13  ;;  %v4793_v47 = vsub.f32 %v3826_v54, %v3856_v53  ;;  %v4797_v54 = vsub.f32 %v3844_v12, %v3856_v53 }
 0x60d   :  { %v4031_v10 = vpop.eup %2266  ;;  %2286 = vpow2.f32 %v3930_v30  ;;  %v1720_v19 = vmul.f32 1.442695, %v4792_v62  ;;  %v1749_v0 = vadd.f32 %v3989_v4, %v1748_v18  ;;  %v4794_v30 = vsub.f32 %v3832_v1, %v3856_v53 }
 0x60e   :  { %v4038_v5 = vpop.eup %2268  ;;  %2288 = vpow2.f32 %v3932_v61  ;;  %v1724_v60 = vmul.f32 1.442695, %v4793_v47  ;;  %v4795_v18 = vsub.f32 %v3838_v7, %v3856_v53 }
 0x60f   :  { %v4044_v33 = vpop.eup %2270  ;;  %2290 = vpow2.f32 %v1712_v51  ;;  %v1728_v13 = vmul.f32 1.442695, %v4794_v30  ;;  %v1750_v17 = vadd.f32 %v3996_v16, %v1749_v0  ;;  %v1736_v51 = vmul.f32 1.442695, %v4797_v54 }
 0x610   :  { %v4050_v62 = vpop.eup %2272  ;;  %2292 = vpow2.f32 %v1716_v48  ;;  %v1732_v61 = vmul.f32 1.442695, %v4795_v18  ;;  %v4798_v0 = vsub.f32 %v3850_v3, %v3856_v53  ;;  %v4801_v53 = vsub.f32 %v3676_v9, %v3858_v26 }
 0x611   :  { %v4055_v22 = vpop.eup %2274  ;;  %2294 = vpow2.f32 %v1720_v19  ;;  %v1751_v47 = vadd.f32 %v4004_v6, %v1750_v17  ;;  %v4799_v19 = vsub.f32 %v3666_v40, %v3858_v26  ;;  %v4800_v17 = vsub.f32 %v3670_v52, %v3858_v26 }
 0x612   :  { %4796 = vst [vmem:[#allocation3_spill] sm:$0xff] %v4055_v22  ;;  %v4061_v1 = vpop.eup %2276  ;;  %2296 = vpow2.f32 %v1724_v60  ;;  %v1740_v48 = vmul.f32 1.442695, %v4798_v0  ;;  %v1626_v3 = vmul.f32 1.442695, %v4801_v53  ;;  %v4802_v40 = vsub.f32 %v3684_v50, %v3858_v26 }
 0x613   :  { %v4066_v30 = vpop.eup %2278  ;;  %2298 = vpow2.f32 %v1728_v13  ;;  %v1752_v7 = vadd.f32 %v4011_v15, %v1751_v47  ;;  %v1618_v18 = vmul.f32 1.442695, %v4799_v19  ;;  %v1622_v60 = vmul.f32 1.442695, %v4800_v17 }
 0x614   :  { %v4072_v12 = vpop.eup %2280  ;;  %2300 = vpow2.f32 %v1732_v61  ;;  %v1630_v47 = vmul.f32 1.442695, %v4802_v40  ;;  %v4803_v61 = vsub.f32 %v3691_v39, %v3858_v26  ;;  %v4804_v52 = vsub.f32 %v3697_v29, %v3858_v26 }
 0x615   :  { %v4080_v54 = vpop.eup %2282  ;;  %2302 = vpow2.f32 %v1736_v51  ;;  %v1753_v13 = vadd.f32 %v4019_v56, %v1752_v7  ;;  %v4805_v51 = vsub.f32 %v3703_v38, %v3858_v26  ;;  %v4806_v7 = vsub.f32 %v3709_v32, %v3858_v26 }
 0x616   :  { %v1634_v0 = vmul.f32 1.442695, %v4803_v61  ;;  %v4089_v19 = vpop.eup %2284  ;;  %2304 = vpow2.f32 %v1740_v48  ;;  %v1638_v9 = vmul.f32 1.442695, %v4804_v52  ;;  %v4807_v48 = vsub.f32 %v3715_v36, %v3858_v26 }
 0x617   :  { %v1642_v17 = vmul.f32 1.442695, %v4805_v51  ;;  %v1646_v50 = vmul.f32 1.442695, %v4806_v7  ;;  %v4100_v53 = vpop.eup %2286  ;;  %v1754_v39 = vadd.f32 %v4025_v14, %v1753_v13  ;;  %2306 = vpow2.f32 %v1618_v18 }
 0x618   :  { %v1650_v40 = vmul.f32 1.442695, %v4807_v48  ;;  %v4808_v29 = vsub.f32 %v3721_v24, %v3858_v26  ;;  %v4109_v52 = vpop.eup %2288  ;;  %2308 = vpow2.f32 %v1622_v60 }
 0x619   :  { %v4117_v13 = vpop.eup %2290  ;;  %v1755_v36 = vadd.f32 %v4031_v10, %v1754_v39  ;;  %2310 = vpow2.f32 %v1626_v3 }
 0x61a   :  { %v1654_v61 = vmul.f32 1.442695, %v4808_v29  ;;  %v4124_v51 = vpop.eup %2292  ;;  %2312 = vpow2.f32 %v1630_v47  ;;  %v4809_v47 = vsub.f32 %v3727_v46, %v3858_v26  ;;  %v4810_v29 = vsub.f32 %v4770_v27, %v3858_v26 }
 0x61b   :  { %v4132_v39 = vpop.eup %2294  ;;  %v1756_v3 = vadd.f32 %v4038_v5, %v1755_v36  ;;  %2314 = vpow2.f32 %v1634_v0 }
 0x61c   :  { %v4139_v24 = vpop.eup %2296  ;;  %2316 = vpow2.f32 %v1638_v9  ;;  %v1658_v60 = vmul.f32 1.442695, %v4809_v47  ;;  %v1662_v48 = vmul.f32 1.442695, %v4810_v29 }
 0x61d   :  { %v4147_v36 = vpop.eup %2298  ;;  %v1757_v0 = vadd.f32 %v4044_v33, %v1756_v3  ;;  %2318 = vpow2.f32 %v1642_v17  ;;  %v4811_v17 = vsub.f32 %v4771_v63, %v3858_v26  ;;  %v4816_v63 = vsub.f32 %v4776_v44, %v3858_v26 }
 0x61e   :  { %v4155_v18 = vpop.eup %2300  ;;  %2320 = vpow2.f32 %v1646_v50  ;;  %v4812_v50 = vsub.f32 %v4772_v41, %v3858_v26  ;;  %v4815_v41 = vsub.f32 %v4775_v45, %v3858_v26  ;;  %v4819_v44 = vsub.f32 %v4779_v20, %v3858_v26 }
 0x61f   :  { %v4160_v7 = vpop.eup %2302  ;;  %v1758_v32 = vadd.f32 %v4050_v62, %v1757_v0  ;;  %2322 = vpow2.f32 %v1650_v40  ;;  %v1666_v46 = vmul.f32 1.442695, %v4811_v17  ;;  %v4813_v40 = vsub.f32 %v4773_v25, %v3858_v26 }
 0x620   :  { %v4168_v47 = vpop.eup %2304  ;;  %2324 = vpow2.f32 %v1654_v61  ;;  %v1670_v27 = vmul.f32 1.442695, %v4812_v50  ;;  %v4814_v61 = vsub.f32 %v4774_v55, %v3858_v26  ;;  %v1682_v50 = vmul.f32 1.442695, %v4815_v41 }
 0x621   :  { %v2307_v29 = vpop.eup %2306  ;;  %v1759_v9 = vadd.f32 %v4055_v22, %v1758_v32  ;;  %2326 = vpow2.f32 %v1658_v60  ;;  %v1674_v0 = vmul.f32 1.442695, %v4813_v40  ;;  %v4817_v55 = vsub.f32 %v4777_v42, %v3858_v26 }
 0x622   :  { %v2309_v17 = vpop.eup %2308  ;;  %2328 = vpow2.f32 %v1662_v48  ;;  %v1678_v3 = vmul.f32 1.442695, %v4814_v61  ;;  %v1686_v48 = vmul.f32 1.442695, %v4816_v63  ;;  %v1698_v63 = vmul.f32 1.442695, %v4819_v44 }
 0x623   :  { %v2311_v38 = vpop.eup %2310  ;;  %v1760_v32 = vadd.f32 %v4061_v1, %v1759_v9  ;;  %2330 = vpow2.f32 %v1666_v46  ;;  %v1781_v60 = vadd.f32 %v2309_v17, %v2307_v29  ;;  %v1827_v25 = vpack.c.bf16 %v2309_v17, %v2307_v29 }
 0x624   :  { %v2313_v40 = vpop.eup %2312  ;;  %2332 = vpow2.f32 %v1670_v27  ;;  %v1690_v61 = vmul.f32 1.442695, %v4817_v55  ;;  %v4818_v27 = vsub.f32 %v4778_v21, %v3858_v26  ;;  %v4820_v42 = vpack.c.bf16 %v3950_v31, %v3942_v8 }
 0x625   :  { %v2315_v22 = vpop.eup %2314  ;;  %v1761_v45 = vadd.f32 %v4066_v30, %v1760_v32  ;;  %2334 = vpow2.f32 %v1674_v0  ;;  %v1782_v41 = vadd.f32 %v2311_v38, %v1781_v60  ;;  %1858 = vmatprep.subr.bf16.mxu0 %v1827_v25  ;;  %v1829_v9 = vpack.c.bf16 %v2313_v40, %v2311_v38 }
 0x626   :  { %v2317_v46 = vpop.eup %2316  ;;  %2336 = vpow2.f32 %v1678_v3  ;;  %v1694_v29 = vmul.f32 1.442695, %v4818_v27  ;;  %1859 = vmatpush1.bf16.msra.mxu0 %v4820_v42  ;;  %v4821_v21 = vsub.f32 %v4780_v58, %v3858_v26  ;;  %v4822_v20 = vsub.f32 %v4781_v28, %v3858_v26  ;;  %v4827_v42 = vld [vmem:[#allocation17_spill] sm:$0xff] }
 0x627   :  { %v2319_v17 = vpop.eup %2318  ;;  %v1762_v0 = vadd.f32 %v4072_v12, %v1761_v45  ;;  %2338 = vpow2.f32 %v1682_v50  ;;  %v1783_v32 = vadd.f32 %v2313_v40, %v1782_v41  ;;  %1860 = vmatprep.subr.bf16.mxu0 %v1829_v9  ;;  %v1831_v38 = vpack.c.bf16 %v2317_v46, %v2315_v22 }
 0x628   :  { %v2321_v3 = vpop.eup %2320  ;;  %2340 = vpow2.f32 %v1686_v48  ;;  %v1702_v60 = vmul.f32 1.442695, %v4821_v21  ;;  %v1706_v25 = vmul.f32 1.442695, %v4822_v20  ;;  %v4823_v40 = vsub.f32 %v4782_v43, %v3858_v26 }
 0x629   :  { %v2323_v55 = vpop.eup %2322  ;;  %v1763_v8 = vadd.f32 %v4080_v54, %v1762_v0  ;;  %2342 = vpow2.f32 %v1690_v61  ;;  %v1784_v31 = vadd.f32 %v2315_v22, %v1783_v32  ;;  %v1833_v45 = vpack.c.bf16 %v2321_v3, %v2319_v17 }
 0x62a   :  { %v2325_v50 = vpop.eup %2324  ;;  %2344 = vpow2.f32 %v1694_v29  ;;  %v1710_v48 = vmul.f32 1.442695, %v4823_v40  ;;  %v4824_v58 = vsub.f32 %v4783_v57, %v3858_v26  ;;  %v4825_v28 = vpack.c.bf16 %v3966_v49, %v3958_v35 }
 0x62b   :  { %v2327_v9 = vpop.eup %2326  ;;  %v1764_v27 = vadd.f32 %v4089_v19, %v1763_v8  ;;  %2346 = vpow2.f32 %v1698_v63  ;;  %v1785_v22 = vadd.f32 %v2317_v46, %v1784_v31  ;;  %v1835_v61 = vpack.c.bf16 %v2325_v50, %v2323_v55 }
 0x62c   :  { %v1714_v41 = vmul.f32 1.442695, %v4824_v58  ;;  %1861 = vmatpush1.bf16.msra.mxu0 %v4825_v28  ;;  %v2329_v29 = vpop.eup %2328  ;;  %2348 = vpow2.f32 %v1702_v60  ;;  %v4826_v43 = vsub.f32 %v4784_v2, %v3858_v26  ;;  %v4828_v57 = vsub.f32 %v4827_v42, %v3858_v26  ;;  %v4830_v60 = vld [vmem:[#allocation24_spill] sm:$0xff] }
 0x62d   :  { %1862 = vmatprep.subr.bf16.mxu0 %v1831_v38  ;;  %v2331_v32 = vpop.eup %2330  ;;  %v1765_v35 = vadd.f32 %v4100_v53, %v1764_v27  ;;  %2350 = vpow2.f32 %v1706_v25  ;;  %v1786_v49 = vadd.f32 %v2319_v17, %v1785_v22  ;;  %v1837_v21 = vpack.c.bf16 %v2329_v29, %v2327_v9 }
 0x62e   :  { %v1718_v44 = vmul.f32 1.442695, %v4826_v43  ;;  %v1722_v0 = vmul.f32 1.442695, %v4828_v57  ;;  %v2333_v63 = vpop.eup %2332  ;;  %2352 = vpow2.f32 %v1710_v48  ;;  %v4829_v46 = vsub.f32 %v4786_v59, %v3858_v26 }
 0x62f   :  { %v4831_v2 = vsub.f32 %v4830_v60, %v3858_v26  ;;  %v4832_v8 = vpack.c.bf16 %v3981_v11, %v3974_v23  ;;  %v2335_v31 = vpop.eup %2334  ;;  %v1766_v40 = vadd.f32 %v4109_v52, %v1765_v35  ;;  %2354 = vpow2.f32 %v1714_v41 }
 0x630   :  { %v1726_v38 = vmul.f32 1.442695, %v4829_v46  ;;  %v1787_v17 = vadd.f32 %v2321_v3, %v1786_v49  ;;  %v1839_v25 = vpack.c.bf16 %v2333_v63, %v2331_v32  ;;  %v2337_v48 = vpop.eup %2336  ;;  %2356 = vpow2.f32 %v1718_v44  ;;  %v4835_v3 = vld [vmem:[#allocation4_spill] sm:$0xff] }
 0x631   :  { %v1730_v20 = vmul.f32 1.442695, %v4831_v2  ;;  %1863 = vmatpush1.bf16.msra.mxu0 %v4832_v8  ;;  %v4833_v59 = vsub.f32 %v4788_v37, %v3858_v26  ;;  %v4834_v28 = vsub.f32 %v4789_v34, %v3858_v26  ;;  %v2339_v22 = vpop.eup %2338  ;;  %v1767_v11 = vadd.f32 %v4117_v13, %v1766_v40 }
 0x632   :  { %1864 = vmatprep.subr.bf16.mxu0 %v1833_v45  ;;  %2358 = vpow2.f32 %v1722_v0  ;;  %v1788_v23 = vadd.f32 %v2323_v55, %v1787_v17  ;;  %v1841_v43 = vpack.c.bf16 %v2337_v48, %v2335_v31  ;;  %v2341_v41 = vpop.eup %2340  ;;  %v4836_v45 = vsub.f32 %v4835_v3, %v3858_v26 }
 0x633   :  { %v1734_v58 = vmul.f32 1.442695, %v4833_v59  ;;  %v1738_v27 = vmul.f32 1.442695, %v4834_v28  ;;  %2360 = vpow2.f32 %v1726_v38  ;;  %v4837_v37 = vpack.c.bf16 %v3996_v16, %v3989_v4  ;;  %v2343_v42 = vpop.eup %2342 }
 0x634   :  { %v1742_v44 = vmul.f32 1.442695, %v4836_v45  ;;  %v1768_v34 = vadd.f32 %v4124_v51, %v1767_v11  ;;  %2362 = vpow2.f32 %v1730_v20  ;;  %v1789_v57 = vadd.f32 %v2325_v50, %v1788_v23  ;;  %v2345_v0 = vpop.eup %2344 }
 0x635   :  { %1865 = vmatpush1.bf16.msra.mxu0 %v4837_v37  ;;  %v1843_v35 = vpack.c.bf16 %v2341_v41, %v2339_v22  ;;  %2364 = vpow2.f32 %v1734_v58  ;;  %v2347_v55 = vpop.eup %2346  ;;  %v1845_v26 = vpack.c.bf16 %v2345_v0, %v2343_v42  ;;  %v4838_v16 = vpack.c.bf16 %v4011_v15, %v4004_v6 }
 0x636   :  { %1866 = vmatprep.subr.bf16.mxu0 %v1835_v61  ;;  %v1769_v49 = vadd.f32 %v4132_v39, %v1768_v34  ;;  %2366 = vpow2.f32 %v1738_v27  ;;  %v1790_v46 = vadd.f32 %v2327_v9, %v1789_v57  ;;  %v2349_v38 = vpop.eup %2348  ;;  %v4839_v59 = vpack.c.bf16 %v4025_v14, %v4019_v56 }
 0x637   :  { %2368 = vpow2.f32 %v1742_v44  ;;  %v2351_v4 = vpop.eup %2350  ;;  %v1847_v61 = vpack.c.bf16 %v2349_v38, %v2347_v55  ;;  %v4841_v34 = vpack.c.bf16 %v4050_v62, %v4044_v33  ;;  %v4845_v33 = vpack.c.bf16 %v4089_v19, %v4080_v54 }
 0x638   :  { %v1770_v60 = vadd.f32 %v4139_v24, %v1769_v49  ;;  %v1791_v50 = vadd.f32 %v2329_v29, %v1790_v46  ;;  %v2353_v2 = vpop.eup %2352  ;;  %v4842_v49 = vld [vmem:[#allocation3_spill] sm:$0xff]  ;;  %v4848_v54 = vpack.c.bf16 %v4139_v24, %v4132_v39  ;;  %v4855_v24 = vld [vmem:[#allocation33_spill] sm:$0xff] }
 0x639   :  { %1867 = vmatpush1.bf16.msra.mxu0 %v4838_v16  ;;  %v2355_v20 = vpop.eup %2354  ;;  %v1849_v17 = vpack.c.bf16 %v2353_v2, %v2351_v4  ;;  %v4854_v16 = vld [vmem:[#allocation34_spill] sm:$0xff] }
 0x63a   :  { %1868 = vmatprep.subr.bf16.mxu0 %v1837_v21  ;;  %v1771_v8 = vadd.f32 %v4147_v36, %v1770_v60  ;;  %v1792_v40 = vadd.f32 %v2331_v32, %v1791_v50  ;;  %v2357_v9 = vpop.eup %2356  ;;  %v4840_v32 = vpack.c.bf16 %v4038_v5, %v4031_v10  ;;  %v4843_v10 = vpack.c.bf16 %v4061_v1, %v4842_v49  ;;  %v4858_v60 = vld [vmem:[#allocation31_spill] sm:$0xff] }
 0x63b   :  { %v1851_v28 = vpack.c.bf16 %v2357_v9, %v2355_v20  ;;  %v4846_v1 = vpack.c.bf16 %v4109_v52, %v4100_v53  ;;  %v4849_v53 = vpack.c.bf16 %v4155_v18, %v4147_v36  ;;  %v4856_v39 = vpack.c.bf16 %v4854_v16, %v4855_v24  ;;  %v4861_v36 = vld [vmem:[#allocation37_spill] sm:$0xff]  ;;  %v2407_v24 = vld [vmem:[%s4432_s0 + $0xb8] sm:$0xff] }
 0x63c   :  { %v2359_v58 = vpop.eup %2358  ;;  %v1772_v15 = vadd.f32 %v4155_v18, %v1771_v8  ;;  %v1793_v6 = vadd.f32 %v2333_v63, %v1792_v40  ;;  %v4860_v18 = vld [vmem:[#allocation38_spill] sm:$0xff]  ;;  %v4867_v8 = vld [vmem:[#allocation41_spill] sm:$0xff] }
 0x63d   :  { %1869 = vmatpush1.bf16.msra.mxu0 %v4839_v59  ;;  %v2361_v29 = vpop.eup %2360 }
 0x63e   :  { %1870 = vmatprep.subr.bf16.mxu0 %v1839_v25  ;;  %v2363_v21 = vpop.eup %2362  ;;  %v1773_v27 = vadd.f32 %v4160_v7, %v1772_v15  ;;  %v1794_v11 = vadd.f32 %v2335_v31, %v1793_v6  ;;  %v1853_v23 = vpack.c.bf16 %v2361_v29, %v2359_v58 }
 0x63f   :  { %v2365_v3 = vpop.eup %2364 }
 0x640   :  { %v2367_v45 = vpop.eup %2366  ;;  %v1774_v14 = vadd.f32 %v4168_v47, %v1773_v27  ;;  %v1795_v56 = vadd.f32 %v2337_v48, %v1794_v11  ;;  %v1855_v44 = vpack.c.bf16 %v2365_v3, %v2363_v21  ;;  %v4844_v48 = vpack.c.bf16 %v4072_v12, %v4066_v30 }
 0x641   :  { %1871 = vmatpush1.bf16.msra.mxu0 %v4840_v32  ;;  %v2369_v63 = vpop.eup %2368  ;;  %v4847_v30 = vpack.c.bf16 %v4124_v51, %v4117_v13  ;;  %v4850_v13 = vpack.c.bf16 %v4168_v47, %v4160_v7  ;;  %v4851_v51 = vld [vmem:[#allocation30_spill] sm:$0xff]  ;;  %v4866_v47 = vld [vmem:[#allocation43_spill] sm:$0xff] }
 0x642   :  { %1872 = vmatprep.subr.bf16.mxu0 %v1841_v43  ;;  %v1796_v25 = vadd.f32 %v2339_v22, %v1795_v56  ;;  %v1857_v37 = vpack.c.bf16 %v2369_v63, %v2367_v45  ;;  %v4868_v40 = vpack.c.bf16 %v4866_v47, %v4867_v8  ;;  %v2409_v47 = vld [vmem:[%s4432_s0 + $0xc8] sm:$0xff] }
 0x644   :  { %v1797_v31 = vadd.f32 %v2341_v41, %v1796_v25 }
 0x645   :  { %1873 = vmatpush1.bf16.msra.mxu0 %v4841_v34 }
 0x646   :  { %1874 = vmatprep.subr.bf16.mxu0 %v1843_v35  ;;  %v1798_v57 = vadd.f32 %v2343_v42, %v1797_v31 }
 0x648   :  { %v1799_v5 = vadd.f32 %v2345_v0, %v1798_v57 }
 0x649   :  { %1875 = vmatpush1.bf16.msra.mxu0 %v4843_v10  ;;  %v2400_v10 = vld [vmem:[%s4432_s0 + $0x80] sm:$0xff] }
 0x64a   :  { %1876 = vmatprep.subr.bf16.mxu0 %v1845_v26  ;;  %v1800_v46 = vadd.f32 %v2347_v55, %v1799_v5  ;;  %v4852_v26 = vld [vmem:[#allocation29_spill] sm:$0xff] }
 0x64c   :  { %v1801_v22 = vadd.f32 %v2349_v38, %v1800_v46  ;;  %v4853_v38 = vpack.c.bf16 %v4851_v51, %v4852_v26 }
 0x64d   :  { %1877 = vmatpush1.bf16.msra.mxu0 %v4844_v48 }
 0x64e   :  { %1878 = vmatprep.subr.bf16.mxu0 %v1847_v61  ;;  %v1802_v43 = vadd.f32 %v2351_v4, %v1801_v22  ;;  %v4857_v4 = vld [vmem:[#allocation32_spill] sm:$0xff]  ;;  %v4862_v61 = vpack.c.bf16 %v4860_v18, %v4861_v36 }
 0x64f   :  { %v4859_v50 = vpack.c.bf16 %v4857_v4, %v4858_v60  ;;  %v2401_v22 = vld [vmem:[%s4432_s0 + $0x88] sm:$0xff] }
 0x650   :  { %v1803_v62 = vadd.f32 %v2353_v2, %v1802_v43  ;;  %v4863_v2 = vld [vmem:[#allocation36_spill] sm:$0xff] }
 0x651   :  { %1879 = vmatpush1.bf16.msra.mxu0 %v4845_v33 }
 0x652   :  { %1880 = vmatprep.subr.bf16.mxu0 %v1849_v17  ;;  %v1804_v41 = vadd.f32 %v2355_v20, %v1803_v62  ;;  %v4864_v20 = vld [vmem:[#allocation35_spill] sm:$0xff]  ;;  %v4869_v17 = vld [vmem:[#allocation40_spill] sm:$0xff]  ;;  %v2402_v62 = vld [vmem:[%s4432_s0 + $0x90] sm:$0xff] }
 0x653   :  { %v4865_v7 = vpack.c.bf16 %v4863_v2, %v4864_v20 }
 0x654   :  { %v1805_v42 = vadd.f32 %v2357_v9, %v1804_v41  ;;  %v4870_v9 = vld [vmem:[#allocation39_spill] sm:$0xff] }
 0x655   :  { %1881 = vmatpush1.bf16.msra.mxu0 %v4846_v1  ;;  %v4871_v59 = vpack.c.bf16 %v4869_v17, %v4870_v9  ;;  %v2403_v1 = vld [vmem:[%s4432_s0 + $0x98] sm:$0xff]  ;;  %v2410_v17 = vld [vmem:[%s4432_s0 + $0xd0] sm:$0xff] }
 0x656   :  { %1882 = vmatprep.subr.bf16.mxu0 %v1851_v28  ;;  %v1806_v35 = vadd.f32 %v2359_v58, %v1805_v42  ;;  %v1775_v58 = vrot.slane %v1774_v14, 4 }
 0x658   :  { %v1807_v12 = vadd.f32 %v2361_v29, %v1806_v35  ;;  %v1776_v6 = vadd.f32 %v1775_v58, %v1774_v14 }
 0x659   :  { %1883 = vmatpush1.bf16.msra.mxu0 %v4847_v30 }
 0x65a   :  { %1884 = vmatprep.subr.bf16.mxu0 %v1853_v23  ;;  %v1808_v0 = vadd.f32 %v2363_v21, %v1807_v12  ;;  %v1777_v29 = vrot.slane %v1776_v6, 2 }
 0x65c   :  { %v1809_v19 = vadd.f32 %v2365_v3, %v1808_v0  ;;  %v1778_v27 = vadd.f32 %v1777_v29, %v1776_v6 }
 0x65d   :  { %1885 = vmatpush1.bf16.msra.mxu0 %v4848_v54 }
 0x65e   :  { %1886 = vmatprep.subr.bf16.mxu0 %v1855_v44  ;;  %v1810_v55 = vadd.f32 %v2367_v45, %v1809_v19  ;;  %v1779_v23 = vrot.slane %v1778_v27, 1  ;;  %v2404_v19 = vld [vmem:[%s4432_s0 + $0xa0] sm:$0xff] }
 0x660   :  { %v1811_v52 = vadd.f32 %v2369_v63, %v1810_v55  ;;  %v1780_v32 = vadd.f32 %v1779_v23, %v1778_v27  ;;  %v4872_v63 = vld [vmem:[#allocation28_spill] sm:$0xff]  ;;  %v2412_v27 = vld [vmem:[%s4432_s0 + $0xe0] sm:$0xff] }
 0x661   :  { %1887 = vmatpush1.bf16.msra.mxu0 %v4849_v53 }
 0x662   :  { %1888 = vmatprep.subr.bf16.mxu0 %v1857_v37  ;;  %v1812_v15 = vrot.slane %v1811_v52, 4  ;;  %2370 = vrcp.f32 %v1780_v32  ;;  %v2413_v32 = vld [vmem:[%s4432_s0 + $0xe8] sm:$0xff] }
 0x664   :  { %v1813_v28 = vadd.f32 %v1812_v15, %v1811_v52 }
 0x665   :  { %1889 = vmatpush1.bf16.msra.mxu0 %v4850_v13  ;;  %v2405_v13 = vld [vmem:[%s4432_s0 + $0xa8] sm:$0xff] }
 0x666   :  { %v1814_v21 = vrot.slane %v1813_v28, 2 }
 0x668   :  { %1891 = vmatmul.mubr.bf16.vlgmr.msra.gmra.mrb[56].mxu0 %v4853_v38  ;;  %v1815_v11 = vadd.f32 %v1814_v21, %v1813_v28  ;;  %v2406_v38 = vld [vmem:[%s4432_s0 + $0xb0] sm:$0xff] }
 0x669   :  { %1900 = vmatprep.mubr.bf16.mxu0 %v4856_v39 }
 0x66a   :  { %v1816_v3 = vrot.slane %v1815_v11, 1 }
 0x66c   :  { %v1817_v45 = vadd.f32 %v1816_v3, %v1815_v11  ;;  %v2371_v56 = vpop.eup %2370 }
 0x66d   :  { %v4315_v25 = vmul.f32 %v2371_v56, %v4872_v63 }
 0x66e   :  { %2372 = vrcp.f32 %v1817_v45 }
 0x670   :  { %1901 = vmatmul.mubr.bf16.gmra.mrb[60].mxu0 %v4859_v50 }
 0x671   :  { %1910 = vmatprep.mubr.bf16.mxu0 %v4862_v61  ;;  %v2408_v61 = vld [vmem:[%s4432_s0 + $0xc0] sm:$0xff] }
 0x678   :  { %1911 = vmatmul.mubr.bf16.gmra.mrb[64].mxu0 %v4865_v7  ;;  %v2373_v44 = vpop.eup %2372 }
 0x679   :  { %1920 = vmatprep.mubr.bf16.mxu0 %v4868_v40  ;;  %v4318_v37 = vmul.f32 %v2373_v44, %v4872_v63  ;;  %v2414_v44 = vld [vmem:[%s4432_s0 + $0xf0] sm:$0xff] }
 0x680   :  { %1921 = vmatmul.mubr.bf16.gmra.mrb[68].mxu0 %v4871_v59  ;;  %v2411_v59 = vld [vmem:[%s4432_s0 + $0xd8] sm:$0xff] }
 0x73b   :  { %v1892_v14 = vpop.f32.mrb[56].mxu0 }
 0x73c   :  { %v1935_v34 = vmul.f32 %v4315_v25, %v1892_v14  ;;  %v1894_v31 = vpop.f32.mrb[57].mxu0 }
 0x73d   :  { %v1936_v57 = vmul.f32 %v4318_v37, %v1894_v31  ;;  %v1896_v49 = vpop.f32.mrb[58].mxu0 }
 0x73e   :  { %v1951_v5 = vadd.f32 %v2400_v10, %v1935_v34  ;;  %v1937_v46 = vmul.f32 %v4315_v25, %v1896_v49  ;;  %v1898_v48 = vpop.f32.mrb[59].mxu0 }
 0x73f   :  { %v1952_v43 = vadd.f32 %v2401_v22, %v1936_v57  ;;  %v1938_v33 = vmul.f32 %v4318_v37, %v1898_v48 }
 0x740   :  { %2058 = vst [vmem:[%s4436_s4 + $0x80] sm:$0xff] %v1951_v5  ;;  %v1953_v41 = vadd.f32 %v2402_v62, %v1937_v46 }
 0x741   :  { %2059 = vst [vmem:[%s4436_s4 + $0x88] sm:$0xff] %v1952_v43  ;;  %v1954_v42 = vadd.f32 %v2403_v1, %v1938_v33 }
 0x742   :  { %2060 = vst [vmem:[%s4436_s4 + $0x90] sm:$0xff] %v1953_v41 }
 0x743   :  { %2061 = vst [vmem:[%s4436_s4 + $0x98] sm:$0xff] %v1954_v42  ;;  %v1902_v35 = vpop.f32.mrb[60].mxu0 }
 0x744   :  { %v1939_v30 = vmul.f32 %v4315_v25, %v1902_v35  ;;  %v1904_v12 = vpop.f32.mrb[61].mxu0 }
 0x745   :  { %v1940_v0 = vmul.f32 %v4318_v37, %v1904_v12  ;;  %v1906_v54 = vpop.f32.mrb[62].mxu0 }
 0x746   :  { %v1955_v55 = vadd.f32 %v2404_v19, %v1939_v30  ;;  %v1941_v53 = vmul.f32 %v4315_v25, %v1906_v54  ;;  %v1908_v52 = vpop.f32.mrb[63].mxu0 }
 0x747   :  { %v1956_v51 = vadd.f32 %v2405_v13, %v1940_v0  ;;  %v1942_v26 = vmul.f32 %v4318_v37, %v1908_v52 }
 0x748   :  { %2062 = vst [vmem:[%s4436_s4 + $0xa0] sm:$0xff] %v1955_v55  ;;  %v1957_v16 = vadd.f32 %v2406_v38, %v1941_v53 }
 0x749   :  { %2063 = vst [vmem:[%s4436_s4 + $0xa8] sm:$0xff] %v1956_v51  ;;  %v1958_v39 = vadd.f32 %v2407_v24, %v1942_v26 }
 0x74a   :  { %2064 = vst [vmem:[%s4436_s4 + $0xb0] sm:$0xff] %v1957_v16 }
 0x74b   :  { %2065 = vst [vmem:[%s4436_s4 + $0xb8] sm:$0xff] %v1958_v39  ;;  %v1912_v4 = vpop.f32.mrb[64].mxu0 }
 0x74c   :  { %v1943_v60 = vmul.f32 %v4315_v25, %v1912_v4  ;;  %v1914_v50 = vpop.f32.mrb[65].mxu0 }
 0x74d   :  { %v1944_v18 = vmul.f32 %v4318_v37, %v1914_v50  ;;  %v1916_v36 = vpop.f32.mrb[66].mxu0 }
 0x74e   :  { %v1959_v2 = vadd.f32 %v2408_v61, %v1943_v60  ;;  %v1945_v20 = vmul.f32 %v4315_v25, %v1916_v36  ;;  %v1918_v7 = vpop.f32.mrb[67].mxu0 }
 0x74f   :  { %v1960_v8 = vadd.f32 %v2409_v47, %v1944_v18  ;;  %v1946_v40 = vmul.f32 %v4318_v37, %v1918_v7 }
 0x750   :  { %2066 = vst [vmem:[%s4436_s4 + $0xc0] sm:$0xff] %v1959_v2  ;;  %v1961_v9 = vadd.f32 %v2410_v17, %v1945_v20 }
 0x751   :  { %2067 = vst [vmem:[%s4436_s4 + $0xc8] sm:$0xff] %v1960_v8  ;;  %v1962_v58 = vadd.f32 %v2411_v59, %v1946_v40 }
 0x752   :  { %2068 = vst [vmem:[%s4436_s4 + $0xd0] sm:$0xff] %v1961_v9 }
 0x753   :  { %2069 = vst [vmem:[%s4436_s4 + $0xd8] sm:$0xff] %v1962_v58  ;;  %v1922_v15 = vpop.f32.mrb[68].mxu0 }
 0x754   :  { %v1947_v6 = vmul.f32 %v4315_v25, %v1922_v15  ;;  %v1924_v28 = vpop.f32.mrb[69].mxu0 }
 0x755   :  { %v1948_v29 = vmul.f32 %v4318_v37, %v1924_v28  ;;  %v1926_v21 = vpop.f32.mrb[70].mxu0 }
 0x756   :  { %v1963_v11 = vadd.f32 %v2412_v27, %v1947_v6  ;;  %v1949_v23 = vmul.f32 %v4315_v25, %v1926_v21  ;;  %v1928_v3 = vpop.f32.mrb[71].mxu0  ;;  %v2415_v25 = vld [vmem:[%s4432_s0 + $0xf8] sm:$0xff] }
 0x757   :  { %v1964_v45 = vadd.f32 %v2413_v32, %v1948_v29  ;;  %v1950_v56 = vmul.f32 %v4318_v37, %v1928_v3 }
 0x758   :  { %2070 = vst [vmem:[%s4436_s4 + $0xe0] sm:$0xff] %v1963_v11  ;;  %v1965_v63 = vadd.f32 %v2414_v44, %v1949_v23 }
 0x759   :  { %2071 = vst [vmem:[%s4436_s4 + $0xe8] sm:$0xff] %v1964_v45  ;;  %v1966_v14 = vadd.f32 %v2415_v25, %v1950_v56 }
 0x75a   :  { %2072 = vst [vmem:[%s4436_s4 + $0xf0] sm:$0xff] %v1965_v63 }
 0x75b   :  { %2073 = vst [vmem:[%s4436_s4 + $0xf8] sm:$0xff] %v1966_v14 }

</bundles_post_ra>
